<compile_context>
chip_gen: v7x
topology: tpu7x:2x2x1
jax: 0.10.0
libtpu: 0.0.40
codegen_flags: <defaults>
</compile_context>

<pallas_src>
import functools
import math

import jax
import jax.numpy as jnp
from jax.experimental import pallas as pl
from jax.experimental.pallas import tpu as pltpu


# ----------------------------------------------------------------------------
# Config (scaled-down synthetic; original: win_size=1200, spk_emb_dim=512, 16 conformer blocks)
# ----------------------------------------------------------------------------
WIN = 256                  # STFT window / "fft_dim"
HOP = WIN // 2             # 128 (50% overlap -> half-frame STFT trick applies)
FBINS = WIN // 2 + 1       # 129 (onesided)
FP = 256                   # lane-dense padded frequency width (multiple of 128)
SPK_EMB = 128              # spk_emb_dim
XVEC_H = 128               # x_vec_adaptor_hidden_size
WAVLM_D = 128              # WavLM feature dim (stand-in)
WAVLM_WIN = 400            # 25 ms @ 16 kHz
WAVLM_HOP = 320            # 20 ms @ 16 kHz
MP_H = 256                 # mask-predictor hidden width

# Spectrogram-time rows per block. 256 keeps the fused call well under v7x's 64 MiB VMEM even
# at original scale (WIN=1200 -> FP=640); raise to 512 on v5e/v6e (128 MiB) for higher HBM
# roofline fraction. Must stay a multiple of 32 (repeat-by-4 + (8,128) block rule).
MAX_ROWS = 256


def _round_up(x, m):
    return ((x + m - 1) // m) * m


# ----------------------------------------------------------------------------
# Pallas kernels
# ----------------------------------------------------------------------------

def _xvec_pool_kernel(fr_ref, w_ref, b_ref, o_ref):
    # relu(frames @ W + b) mean-pooled over time; hidden activation never leaves VMEM/vregs.
    h = jnp.dot(fr_ref[0].astype(jnp.bfloat16), w_ref[...],
                preferred_element_type=jnp.float32)
    h = jnp.maximum(h + b_ref[...], 0.0)
    o_ref[0] = jnp.mean(h, axis=0, keepdims=True)


def _wavlm_kernel(fr_ref, cond_ref, wf_ref, bf_ref, wa_ref, ba_ref, o_ref):
    # relu(frames @ Wf + bf) + spk-conditioning, then the adaptation matmul — fully fused.
    h = jnp.dot(fr_ref[0].astype(jnp.bfloat16), wf_ref[...],
                preferred_element_type=jnp.float32)
    h = jnp.maximum(h + bf_ref[...], 0.0) + cond_ref[0]
    o = jnp.dot(h.astype(jnp.bfloat16), wa_ref[...],
                preferred_element_type=jnp.float32) + ba_ref[...]
    o_ref[0] = o


def _spec_mask_kernel(hfa_ref, hfb_ref, feat_ref, dfta_ref, dftb_ref,
                      wf_ref, ws_ref, b1_ref, w2_ref, b2_ref,
                      mask_ref, est_ref, re_ref, im_ref, *, bt, g):
    # ---- STFT: frame t = [half-frame t | half-frame t+1]; two bf16 MXU dots against the
    #      Hann-windowed (cos | -sin) DFT halves (review: bf16 STFT on a bf16-native MXU).
    cs = jnp.dot(hfa_ref[0].astype(jnp.bfloat16), dfta_ref[...],
                 preferred_element_type=jnp.float32)
    cs = cs + jnp.dot(hfb_ref[0].astype(jnp.bfloat16), dftb_ref[...],
                      preferred_element_type=jnp.float32)
    re = cs[:, :FP]
    im = cs[:, FP:]
    logmag = 0.5 * jnp.log(re * re + im * im + 1e-12)     # log-magnitude spectrogram
    re_ref[0] = re.astype(jnp.bfloat16)                    # phase source, bf16 (half traffic)
    im_ref[0] = im.astype(jnp.bfloat16)

    # ---- repeat_interleave(4) (+ replicate-pad, pre-baked into feat rows) folded in via a
    #      one-hot selection matmul: sel[t, c] = 1 iff c == t // 4.
    rows = jax.lax.broadcasted_iota(jnp.int32, (bt, g), 0)
    cols = jax.lax.broadcasted_iota(jnp.int32, (bt, g), 1)
    lo = cols * 4
    sel = jnp.where((rows >= lo) & (rows < lo + 4), 1.0, 0.0).astype(jnp.bfloat16)
    feat_rep = jnp.dot(sel, feat_ref[0].astype(jnp.bfloat16),
                       preferred_element_type=jnp.float32)

    # ---- MaskPredictor stand-in: 2-layer MLP over [feat | spec] (concat expressed as two dots)
    #      fused with est_y_spec = (mix_spec - mask).clamp(min=-100). Hidden stays in vregs.
    h = jnp.dot(feat_rep.astype(jnp.bfloat16), wf_ref[...],
                preferred_element_type=jnp.float32)
    h = h + jnp.dot(logmag.astype(jnp.bfloat16), ws_ref[...],
                    preferred_element_type=jnp.float32)
    h = jnp.maximum(h + b1_ref[...], 0.0)
    mask = jnp.dot(h.astype(jnp.bfloat16), w2_ref[...],
                   preferred_element_type=jnp.float32) + b2_ref[...]
    mask_ref[0] = mask
    est_ref[0] = jnp.maximum(logmag - mask, -100.0)


# ----------------------------------------------------------------------------
# Pallas wrappers
# ----------------------------------------------------------------------------

def xvec_pool_pallas(frames, w, b):
    """frames: [B, Tr, WIN] f32; w: bf16 [WIN, H]; b: f32 [1, H]. Returns pooled [B, H] f32."""
    B, Tr, W = frames.shape
    H = w.shape[1]
    out = pl.pallas_call(
        _xvec_pool_kernel,
        out_shape=jax.ShapeDtypeStruct((B, 1, H), jnp.float32),
        grid_spec=pltpu.PrefetchScalarGridSpec(
            num_scalar_prefetch=0,
            grid=(B,),
            in_specs=[
                pl.BlockSpec((1, Tr, W), lambda b: (b, 0, 0)),
                pl.BlockSpec((W, H), lambda b: (0, 0)),
                pl.BlockSpec((1, H), lambda b: (0, 0)),
            ],
            out_specs=pl.BlockSpec((1, 1, H), lambda b: (b, 0, 0)),
        ),
        compiler_params=pltpu.CompilerParams(dimension_semantics=("parallel",)),
    )(frames, w, b)
    return out.reshape(B, H)


def wavlm_pallas(frames, cond, wf, bf, wa, ba):
    """frames: [B, Tw, WAVLM_WIN] f32; cond: [B, 1, D] f32; weights bf16, biases f32 [1, D]."""
    B, Tw, W = frames.shape
    D = wa.shape[1]
    return pl.pallas_call(
        _wavlm_kernel,
        out_shape=jax.ShapeDtypeStruct((B, Tw, D), jnp.float32),
        grid_spec=pltpu.PrefetchScalarGridSpec(
            num_scalar_prefetch=0,
            grid=(B,),
            in_specs=[
                pl.BlockSpec((1, Tw, W), lambda b: (b, 0, 0)),
                pl.BlockSpec((1, 1, D), lambda b: (b, 0, 0)),
                pl.BlockSpec((W, D), lambda b: (0, 0)),
                pl.BlockSpec((1, D), lambda b: (0, 0)),
                pl.BlockSpec((D, D), lambda b: (0, 0)),
                pl.BlockSpec((1, D), lambda b: (0, 0)),
            ],
            out_specs=pl.BlockSpec((1, Tw, D), lambda b: (b, 0, 0)),
        ),
        compiler_params=pltpu.CompilerParams(dimension_semantics=("parallel",)),
    )(frames, cond, wf, bf, wa, ba)


def spec_mask_pallas(hfa, hfb, feat_pad, dfta, dftb, p, bt):
    """Fused STFT + MaskPredictor MLP + mask application.
    hfa/hfb: [B, T_pad, HOP] f32 half-frames; feat_pad: [B, T_pad//4, D] f32;
    dfta/dftb: bf16 [HOP, 2*FP]. Returns (mask, est) f32 and (re, im) bf16, each [B, T_pad, FP]."""
    B, T_pad, _ = hfa.shape
    g = bt // 4
    nb = T_pad // bt
    return pl.pallas_call(
        functools.partial(_spec_mask_kernel, bt=bt, g=g),
        out_shape=(
            jax.ShapeDtypeStruct((B, T_pad, FP), jnp.float32),
            jax.ShapeDtypeStruct((B, T_pad, FP), jnp.float32),
            jax.ShapeDtypeStruct((B, T_pad, FP), jnp.bfloat16),
            jax.ShapeDtypeStruct((B, T_pad, FP), jnp.bfloat16),
        ),
        grid_spec=pltpu.PrefetchScalarGridSpec(
            num_scalar_prefetch=0,
            grid=(B, nb),
            in_specs=[
                pl.BlockSpec((1, bt, HOP), lambda b, j: (b, j, 0)),
                pl.BlockSpec((1, bt, HOP), lambda b, j: (b, j, 0)),
                pl.BlockSpec((1, g, WAVLM_D), lambda b, j: (b, j, 0)),
                pl.BlockSpec((HOP, 2 * FP), lambda b, j: (0, 0)),
                pl.BlockSpec((HOP, 2 * FP), lambda b, j: (0, 0)),
                pl.BlockSpec((WAVLM_D, MP_H), lambda b, j: (0, 0)),
                pl.BlockSpec((FP, MP_H), lambda b, j: (0, 0)),
                pl.BlockSpec((1, MP_H), lambda b, j: (0, 0)),
                pl.BlockSpec((MP_H, FP), lambda b, j: (0, 0)),
                pl.BlockSpec((1, FP), lambda b, j: (0, 0)),
            ],
            out_specs=(
                pl.BlockSpec((1, bt, FP), lambda b, j: (b, j, 0)),
                pl.BlockSpec((1, bt, FP), lambda b, j: (b, j, 0)),
                pl.BlockSpec((1, bt, FP), lambda b, j: (b, j, 0)),
                pl.BlockSpec((1, bt, FP), lambda b, j: (b, j, 0)),
            ),
        ),
        compiler_params=pltpu.CompilerParams(
            dimension_semantics=("parallel", "parallel"),
            vmem_limit_bytes=32 * 1024 * 1024,
        ),
    )(hfa, hfb, feat_pad, dfta, dftb,
      p["mp_wf"], p["mp_ws"], p["mp_b1"], p["mp_w2"], p["mp_b2"])


# ----------------------------------------------------------------------------
# Glue (framing, params, forward graph)
# ----------------------------------------------------------------------------

def frame_signal(x, win, hop):
    """x: [B, L] -> [B, T, win] (no centering). Only used for the tiny x-vector / WavLM
    stand-in paths; the STFT path uses the gather-free half-frame decomposition.
    TODO(synk): at original scale, frame the WavLM path in-kernel via pl.ds offsets too."""
    B, L = x.shape
    T = (L - win) // hop + 1
    idx = jnp.arange(T)[:, None] * hop + jnp.arange(win)[None, :]
    return x[:, idx]


def make_dft_halves(win):
    """Hann-windowed one-sided DFT [cos | -sin], zero-padded to FP bins, split into the two
    half-frame rows and pre-cast to bf16 (review: bf16-native MXU; split into hi/lo bf16 pairs
    instead if more spectral fidelity is required)."""
    n = jnp.arange(win, dtype=jnp.float32)[:, None]
    f = jnp.arange(win // 2 + 1, dtype=jnp.float32)[None, :]
    ang = 2.0 * math.pi * n * f / win
    hann = 0.5 - 0.5 * jnp.cos(2.0 * math.pi * jnp.arange(win, dtype=jnp.float32) / win)
    cos_m = hann[:, None] * jnp.cos(ang)
    sin_m = -hann[:, None] * jnp.sin(ang)          # minus: exp(-i w)
    cos_p = jnp.zeros((win, FP), jnp.float32).at[:, :win // 2 + 1].set(cos_m)
    sin_p = jnp.zeros((win, FP), jnp.float32).at[:, :win // 2 + 1].set(sin_m)
    dft = jnp.concatenate([cos_p, sin_p], axis=1).astype(jnp.bfloat16)   # [win, 2*FP]
    return dft[:HOP], dft[HOP:]


def _init_linear(key, fan_in, fan_out):
    w = jax.random.normal(key, (fan_in, fan_out), jnp.float32) / jnp.sqrt(float(fan_in))
    b = jnp.zeros((fan_out,), jnp.float32)
    return w, b


def init_params(key):
    """All Pallas matmul operands are pre-cast to bf16 and pre-padded (FP lane-dense) ONCE here,
    so the per-forward graph contains no boundary astype / pad passes."""
    ks = jax.random.split(key, 10)
    xvec_frame_w, xvec_frame_b = _init_linear(ks[0], WIN, XVEC_H)
    wavlm_feat_w, wavlm_feat_b = _init_linear(ks[3], WAVLM_WIN, WAVLM_D)
    wavlm_adapt_w, wavlm_adapt_b = _init_linear(ks[5], WAVLM_D, WAVLM_D)
    mp_wf = jax.random.normal(ks[6], (WAVLM_D, MP_H), jnp.float32) / math.sqrt(WAVLM_D + FBINS)
    mp_ws = jax.random.normal(ks[7], (FBINS, MP_H), jnp.float32) / math.sqrt(WAVLM_D + FBINS)
    mp_w2, mp_b2 = _init_linear(ks[8], MP_H, FBINS)
    dfta, dftb = make_dft_halves(WIN)
    return {
        # AdaptedXVector stand-in
        "xvec_frame_w": xvec_frame_w.astype(jnp.bfloat16),
        "xvec_frame_b": xvec_frame_b.reshape(1, XVEC_H),
        "xvec_h": _init_linear(ks[1], XVEC_H, XVEC_H),        # tiny -> XLA, f32
        "xvec_out": _init_linear(ks[2], XVEC_H, SPK_EMB),     # tiny -> XLA, f32
        # AdaptedWavLM stand-in (num_wavlm_adapt_layers = 1)
        "wavlm_feat_w": wavlm_feat_w.astype(jnp.bfloat16),
        "wavlm_feat_b": wavlm_feat_b.reshape(1, WAVLM_D),
        "wavlm_spk": _init_linear(ks[4], SPK_EMB, WAVLM_D),   # tiny -> XLA, f32
        "wavlm_adapt_w": wavlm_adapt_w.astype(jnp.bfloat16),
        "wavlm_adapt_b": wavlm_adapt_b.reshape(1, WAVLM_D),
        # MaskPredictor stand-in (concat weight stored split; freq rows/cols padded to FP)
        "mp_wf": mp_wf.astype(jnp.bfloat16),
        "mp_ws": jnp.zeros((FP, MP_H), jnp.float32).at[:FBINS].set(mp_ws).astype(jnp.bfloat16),
        "mp_b1": jnp.zeros((1, MP_H), jnp.float32),
        "mp_w2": jnp.zeros((MP_H, FP), jnp.float32).at[:, :FBINS].set(mp_w2).astype(jnp.bfloat16),
        "mp_b2": jnp.zeros((1, FP), jnp.float32).at[:, :FBINS].set(mp_b2.reshape(1, FBINS)),
        # STFT constants
        "dfta": dfta,
        "dftb": dftb,
    }


def adapted_x_vec(params, ref):
    # TODO(synk): real x-vector TDNN + adaptor not available; framed-linear + mean pooling.
    frames = frame_signal(ref, WIN, HOP)                                   # [B, Tr, WIN]
    pooled = xvec_pool_pallas(frames, params["xvec_frame_w"], params["xvec_frame_b"])
    # tiny [B]-row matmuls: plain XLA — a Pallas launch is pure fixed overhead at M=B.
    wh, bh = params["xvec_h"]
    wo, bo = params["xvec_out"]
    h2 = jax.nn.relu(pooled @ wh + bh)
    return h2 @ wo + bo                                                    # [B, SPK_EMB]


def adapted_wavlm(params, mix_16k, spk_emb):
    # TODO(synk): pretrained WavLM transformer not available; fused framed-linear stand-in,
    # speaker-conditioned by an additive projection of spk_emb (one adaptation layer).
    frames = frame_signal(mix_16k, WAVLM_WIN, WAVLM_HOP)                   # [B, Tw, 400]
    ws, bs = params["wavlm_spk"]
    cond = (spk_emb @ ws + bs)[:, None, :]                                 # [B, 1, D] (tiny: XLA)
    return wavlm_pallas(frames, cond,
                        params["wavlm_feat_w"], params["wavlm_feat_b"],
                        params["wavlm_adapt_w"], params["wavlm_adapt_b"])  # [B, Tw, D]


def tse_forward(params, mix, ref):
    B, L = mix.shape

    # spk_emb = self.adapted_x_vec(ref)
    spk_emb = adapted_x_vec(params, ref)

    # torchaudio resample 48k -> 16k
    # TODO(synk): windowed-sinc resampling replaced with naive decimation by 3 (no anti-alias).
    mix_16k = mix[:, ::3]

    # wavlm_features = self.adapted_wavlm(resample(mix), spk_emb)
    wavlm_features = adapted_wavlm(params, mix_16k, spk_emb)               # [B, Tw, D]

    # ---- fused spectrogram + mask predictor + mask application --------------------------
    T = (L - WIN) // HOP + 1
    bt = _round_up(T, 8) if T <= MAX_ROWS else MAX_ROWS
    T_pad = _round_up(T, bt)
    g_total = T_pad // 4

    # 50%-overlap frames expressed as two non-overlapping half-frame tensors (no XLA gather,
    # no 2x-duplicated [B,T,WIN] frame tensor in HBM).
    Lh = L // HOP
    hf = mix[:, :Lh * HOP].reshape(B, Lh, HOP)
    hfa = hf[:, :T]
    hfb = hf[:, 1:T + 1]
    if T_pad > T:
        pad = ((0, 0), (0, T_pad - T), (0, 0))
        hfa = jnp.pad(hfa, pad)
        hfb = jnp.pad(hfb, pad)

    # repeat_interleave(4, dim=1) + replicate-pad: pad the (tiny) WavLM features in time so
    # that dup_pad[:, t] == feat_pad[:, t // 4]; the x4 interleave itself happens in-kernel.
    Tw = wavlm_features.shape[1]
    if g_total <= Tw:
        feat_pad = wavlm_features[:, :g_total]
    else:
        feat_pad = jnp.concatenate(
            [wavlm_features,
             jnp.repeat(wavlm_features[:, -1:], g_total - Tw, axis=1)], axis=1)

    mask_p, est_p, re_p, im_p = spec_mask_pallas(
        hfa, hfb, feat_pad, params["dfta"], params["dftb"], params, bt)

    # Phase from bf16 re/im on the valid one-sided bins only.
    # TODO(synk): atan2 kept in XLA (Mosaic atan2 lowering not relied upon).
    re = re_p[:, :T, :FBINS].astype(jnp.float32)
    im = im_p[:, :T, :FBINS].astype(jnp.float32)
    phase = jnp.arctan2(im, re)

    # TSEPredictionResult(Spectrogram(est_y_spec, mix_phase), mask, wavlm_features)
    return {
        "est_y_spec": est_p[:, :T, :FBINS],
        "est_y_phase": phase,
        "mask": mask_p[:, :T, :FBINS],
        "adapted_wavlm_features": wavlm_features,
    }


if __name__ == "__main__":
    key = jax.random.PRNGKey(0)
    kmix, kref = jax.random.split(key)
    B, L48 = 2, 4800                      # 0.1 s of "48 kHz" audio
    mix = jax.random.normal(kmix, (B, L48), jnp.float32)
    ref = jax.random.normal(kref, (B, L48), jnp.float32)
    params = init_params(jax.random.PRNGKey(42))

    fwd = jax.jit(lambda m, r: tse_forward(params, m, r))
    out = fwd(mix, ref)
    jax.block_until_ready(out)

    T_spec = (L48 - WIN) // HOP + 1       # 36
    assert out["est_y_spec"].shape == (B, T_spec, FBINS)
    assert out["est_y_phase"].shape == (B, T_spec, FBINS)
    assert out["mask"].shape == (B, T_spec, FBINS)
    assert out["adapted_wavlm_features"].shape == (B, 4, WAVLM_D)
    print("KERNEL_OK")
</pallas_src>

<mosaic_0001>
module attributes {stable_mosaic.version = 11 : i64} {
  func.func private @main(%arg0: i32) attributes {dimension_semantics = [#tpu.dimension_semantics<core_parallel>], iteration_bounds = array<i64: 2>, tpu.core_type = #tpu.core_type<sc_scalar_subcore>, window_params = []} {
    return
  }
}

module attributes {stable_mosaic.version = 11 : i64} {
  func.func private @main(%arg0: i32) attributes {dimension_semantics = [#tpu.dimension_semantics<core_parallel>], iteration_bounds = array<i64: 2>, tpu.core_type = #tpu.core_type<sc_scalar_subcore>, window_params = []} {
    return
  }
}

module attributes {stable_mosaic.version = 11 : i64} {
  func.func @_xvec_pool_kernel(%arg0: i32, %arg1: memref<1x36x256xf32, #tpu.memory_space<vmem>>, %arg2: memref<256x128xbf16, #tpu.memory_space<vmem>>, %arg3: memref<1x128xf32, #tpu.memory_space<vmem>>, %arg4: memref<1x1x128xf32, #tpu.memory_space<vmem>>) attributes {dimension_semantics = [#tpu.dimension_semantics<parallel>], iteration_bounds = array<i64: 2>, scalar_prefetch = 0 : i64, scratch_operands = 0 : i64, tpu.core_type = #tpu.core_type<tc>, window_params = [{transform_indices = @transform_0, window_bounds = array<i64: 1, 36, 256>}, {pipeline_mode = #tpu.pipeline_mode<synchronous>, transform_indices = @transform_1, window_bounds = array<i64: 256, 128>}, {pipeline_mode = #tpu.pipeline_mode<synchronous>, transform_indices = @transform_2, window_bounds = array<i64: 1, 128>}, {transform_indices = @transform_3, window_bounds = array<i64: 1, 1, 128>}]} {
    %c0 = arith.constant 0 : index
    %c0_0 = arith.constant 0 : index
    %c0_1 = arith.constant 0 : index
    %0 = vector.load %arg1[%c0, %c0_0, %c0_1] : memref<1x36x256xf32, #tpu.memory_space<vmem>>, vector<1x36x256xf32>
    %1 = vector.shape_cast %0 : vector<1x36x256xf32> to vector<36x256xf32>
    %2 = arith.truncf %1 : vector<36x256xf32> to vector<36x256xbf16>
    %c0_2 = arith.constant 0 : index
    %c0_3 = arith.constant 0 : index
    %3 = vector.load %arg2[%c0_2, %c0_3] : memref<256x128xbf16, #tpu.memory_space<vmem>>, vector<256x128xbf16>
    %cst = arith.constant dense<0.000000e+00> : vector<36x128xf32>
    %4 = tpu.matmul %2, %3, %cst {dimension_numbers = #tpu.dot_dimension_numbers<[1], [0], [0], [1], [0, 0, 1, 1], [], []>} : vector<36x256xbf16>, vector<256x128xbf16>, vector<36x128xf32> -> vector<36x128xf32>
    %c0_4 = arith.constant 0 : index
    %c0_5 = arith.constant 0 : index
    %5 = vector.load %arg3[%c0_4, %c0_5] : memref<1x128xf32, #tpu.memory_space<vmem>>, vector<1x128xf32>
    %6 = vector.broadcast %5 : vector<1x128xf32> to vector<36x128xf32>
    %7 = arith.addf %4, %6 : vector<36x128xf32>
    %cst_6 = arith.constant 0.000000e+00 : f32
    %8 = vector.broadcast %cst_6 : f32 to vector<36x128xf32>
    %9 = arith.maximumf %7, %8 : vector<36x128xf32>
    %cst_7 = arith.constant dense<0.000000e+00> : vector<128xf32>
    %10 = vector.multi_reduction <add>, %9, %cst_7 [0] : vector<36x128xf32> to vector<128xf32>
    %11 = vector.shape_cast %10 : vector<128xf32> to vector<1x128xf32>
    %cst_8 = arith.constant 3.600000e+01 : f32
    %12 = vector.broadcast %cst_8 : f32 to vector<1x128xf32>
    %13 = arith.divf %11, %12 : vector<1x128xf32>
    %c0_9 = arith.constant 0 : index
    %c0_10 = arith.constant 0 : index
    %c0_11 = arith.constant 0 : index
    %14 = vector.load %arg4[%c0_9, %c0_10, %c0_11] : memref<1x1x128xf32, #tpu.memory_space<vmem>>, vector<1x1x128xf32>
    %15 = vector.shape_cast %14 : vector<1x1x128xf32> to vector<1x128xf32>
    %16 = vector.shape_cast %13 : vector<1x128xf32> to vector<1x1x128xf32>
    tpu.vector_store %arg4[%c0_9, %c0_10, %c0_11], %16 {strides = array<i32>} : memref<1x1x128xf32, #tpu.memory_space<vmem>>, vector<1x1x128xf32>,
    return
  }
  func.func @transform_0(%arg0: i32) -> (i32, i32, i32) {
    %c0_i32 = arith.constant 0 : i32
    %c0_i32_0 = arith.constant 0 : i32
    %c0_i32_1 = arith.constant 0 : i32
    return %arg0, %c0_i32, %c0_i32_0 : i32, i32, i32
  }
  func.func @transform_1(%arg0: i32) -> (i32, i32) {
    %c0_i32 = arith.constant 0 : i32
    %c0_i32_0 = arith.constant 0 : i32
    %c0_i32_1 = arith.constant 0 : i32
    return %c0_i32, %c0_i32_0 : i32, i32
  }
  func.func @transform_2(%arg0: i32) -> (i32, i32) {
    %c0_i32 = arith.constant 0 : i32
    %c0_i32_0 = arith.constant 0 : i32
    %c0_i32_1 = arith.constant 0 : i32
    return %c0_i32, %c0_i32_0 : i32, i32
  }
  func.func @transform_3(%arg0: i32) -> (i32, i32, i32) {
    %c0_i32 = arith.constant 0 : i32
    %c0_i32_0 = arith.constant 0 : i32
    %c0_i32_1 = arith.constant 0 : i32
    return %arg0, %c0_i32, %c0_i32_0 : i32, i32, i32
  }
}

module attributes {stable_mosaic.version = 11 : i64} {
  func.func @_wavlm_kernel(%arg0: i32, %arg1: memref<1x4x400xf32, #tpu.memory_space<vmem>>, %arg2: memref<1x1x128xf32, #tpu.memory_space<vmem>>, %arg3: memref<400x128xbf16, #tpu.memory_space<vmem>>, %arg4: memref<1x128xf32, #tpu.memory_space<vmem>>, %arg5: memref<128x128xbf16, #tpu.memory_space<vmem>>, %arg6: memref<1x128xf32, #tpu.memory_space<vmem>>, %arg7: memref<1x4x128xf32, #tpu.memory_space<vmem>>) attributes {dimension_semantics = [#tpu.dimension_semantics<parallel>], iteration_bounds = array<i64: 2>, scalar_prefetch = 0 : i64, scratch_operands = 0 : i64, tpu.core_type = #tpu.core_type<tc>, window_params = [{transform_indices = @transform_0, window_bounds = array<i64: 1, 4, 400>}, {transform_indices = @transform_1, window_bounds = array<i64: 1, 1, 128>}, {pipeline_mode = #tpu.pipeline_mode<synchronous>, transform_indices = @transform_2, window_bounds = array<i64: 400, 128>}, {pipeline_mode = #tpu.pipeline_mode<synchronous>, transform_indices = @transform_3, window_bounds = array<i64: 1, 128>}, {pipeline_mode = #tpu.pipeline_mode<synchronous>, transform_indices = @transform_4, window_bounds = array<i64: 128, 128>}, {pipeline_mode = #tpu.pipeline_mode<synchronous>, transform_indices = @transform_5, window_bounds = array<i64: 1, 128>}, {transform_indices = @transform_6, window_bounds = array<i64: 1, 4, 128>}]} {
    %c0 = arith.constant 0 : index
    %c0_0 = arith.constant 0 : index
    %c0_1 = arith.constant 0 : index
    %0 = vector.load %arg1[%c0, %c0_0, %c0_1] : memref<1x4x400xf32, #tpu.memory_space<vmem>>, vector<1x4x400xf32>
    %1 = vector.shape_cast %0 : vector<1x4x400xf32> to vector<4x400xf32>
    %2 = arith.truncf %1 : vector<4x400xf32> to vector<4x400xbf16>
    %c0_2 = arith.constant 0 : index
    %c0_3 = arith.constant 0 : index
    %3 = vector.load %arg3[%c0_2, %c0_3] : memref<400x128xbf16, #tpu.memory_space<vmem>>, vector<400x128xbf16>
    %cst = arith.constant dense<0.000000e+00> : vector<4x128xf32>
    %4 = tpu.matmul %2, %3, %cst {dimension_numbers = #tpu.dot_dimension_numbers<[1], [0], [0], [1], [0, 0, 1, 1], [], []>} : vector<4x400xbf16>, vector<400x128xbf16>, vector<4x128xf32> -> vector<4x128xf32>
    %c0_4 = arith.constant 0 : index
    %c0_5 = arith.constant 0 : index
    %5 = vector.load %arg4[%c0_4, %c0_5] : memref<1x128xf32, #tpu.memory_space<vmem>>, vector<1x128xf32>
    %6 = vector.broadcast %5 : vector<1x128xf32> to vector<4x128xf32>
    %7 = arith.addf %4, %6 : vector<4x128xf32>
    %cst_6 = arith.constant 0.000000e+00 : f32
    %8 = vector.broadcast %cst_6 : f32 to vector<4x128xf32>
    %9 = arith.maximumf %7, %8 : vector<4x128xf32>
    %c0_7 = arith.constant 0 : index
    %c0_8 = arith.constant 0 : index
    %c0_9 = arith.constant 0 : index
    %10 = vector.load %arg2[%c0_7, %c0_8, %c0_9] : memref<1x1x128xf32, #tpu.memory_space<vmem>>, vector<1x1x128xf32>
    %11 = vector.shape_cast %10 : vector<1x1x128xf32> to vector<1x128xf32>
    %12 = vector.broadcast %11 : vector<1x128xf32> to vector<4x128xf32>
    %13 = arith.addf %9, %12 : vector<4x128xf32>
    %14 = arith.truncf %13 : vector<4x128xf32> to vector<4x128xbf16>
    %c0_10 = arith.constant 0 : index
    %c0_11 = arith.constant 0 : index
    %15 = vector.load %arg5[%c0_10, %c0_11] : memref<128x128xbf16, #tpu.memory_space<vmem>>, vector<128x128xbf16>
    %cst_12 = arith.constant dense<0.000000e+00> : vector<4x128xf32>
    %16 = tpu.matmul %14, %15, %cst_12 {dimension_numbers = #tpu.dot_dimension_numbers<[1], [0], [0], [1], [0, 0, 1, 1], [], []>} : vector<4x128xbf16>, vector<128x128xbf16>, vector<4x128xf32> -> vector<4x128xf32>
    %c0_13 = arith.constant 0 : index
    %c0_14 = arith.constant 0 : index
    %17 = vector.load %arg6[%c0_13, %c0_14] : memref<1x128xf32, #tpu.memory_space<vmem>>, vector<1x128xf32>
    %18 = vector.broadcast %17 : vector<1x128xf32> to vector<4x128xf32>
    %19 = arith.addf %16, %18 : vector<4x128xf32>
    %c0_15 = arith.constant 0 : index
    %c0_16 = arith.constant 0 : index
    %c0_17 = arith.constant 0 : index
    %20 = vector.load %arg7[%c0_15, %c0_16, %c0_17] : memref<1x4x128xf32, #tpu.memory_space<vmem>>, vector<1x4x128xf32>
    %21 = vector.shape_cast %20 : vector<1x4x128xf32> to vector<4x128xf32>
    %22 = vector.shape_cast %19 : vector<4x128xf32> to vector<1x4x128xf32>
    tpu.vector_store %arg7[%c0_15, %c0_16, %c0_17], %22 {strides = array<i32>} : memref<1x4x128xf32, #tpu.memory_space<vmem>>, vector<1x4x128xf32>,
    return
  }
  func.func @transform_0(%arg0: i32) -> (i32, i32, i32) {
    %c0_i32 = arith.constant 0 : i32
    %c0_i32_0 = arith.constant 0 : i32
    %c0_i32_1 = arith.constant 0 : i32
    return %arg0, %c0_i32, %c0_i32_0 : i32, i32, i32
  }
  func.func @transform_1(%arg0: i32) -> (i32, i32, i32) {
    %c0_i32 = arith.constant 0 : i32
    %c0_i32_0 = arith.constant 0 : i32
    %c0_i32_1 = arith.constant 0 : i32
    return %arg0, %c0_i32, %c0_i32_0 : i32, i32, i32
  }
  func.func @transform_2(%arg0: i32) -> (i32, i32) {
    %c0_i32 = arith.constant 0 : i32
    %c0_i32_0 = arith.constant 0 : i32
    %c0_i32_1 = arith.constant 0 : i32
    return %c0_i32, %c0_i32_0 : i32, i32
  }
  func.func @transform_3(%arg0: i32) -> (i32, i32) {
    %c0_i32 = arith.constant 0 : i32
    %c0_i32_0 = arith.constant 0 : i32
    %c0_i32_1 = arith.constant 0 : i32
    return %c0_i32, %c0_i32_0 : i32, i32
  }
  func.func @transform_4(%arg0: i32) -> (i32, i32) {
    %c0_i32 = arith.constant 0 : i32
    %c0_i32_0 = arith.constant 0 : i32
    %c0_i32_1 = arith.constant 0 : i32
    return %c0_i32, %c0_i32_0 : i32, i32
  }
  func.func @transform_5(%arg0: i32) -> (i32, i32) {
    %c0_i32 = arith.constant 0 : i32
    %c0_i32_0 = arith.constant 0 : i32
    %c0_i32_1 = arith.constant 0 : i32
    return %c0_i32, %c0_i32_0 : i32, i32
  }
  func.func @transform_6(%arg0: i32) -> (i32, i32, i32) {
    %c0_i32 = arith.constant 0 : i32
    %c0_i32_0 = arith.constant 0 : i32
    %c0_i32_1 = arith.constant 0 : i32
    return %arg0, %c0_i32, %c0_i32_0 : i32, i32, i32
  }
}

module attributes {stable_mosaic.version = 11 : i64} {
  func.func @_spec_mask_kernel(%arg0: i32, %arg1: i32, %arg2: memref<1x40x128xf32, #tpu.memory_space<vmem>>, %arg3: memref<1x40x128xf32, #tpu.memory_space<vmem>>, %arg4: memref<1x10x128xf32, #tpu.memory_space<vmem>>, %arg5: memref<128x512xbf16, #tpu.memory_space<vmem>>, %arg6: memref<128x512xbf16, #tpu.memory_space<vmem>>, %arg7: memref<128x256xbf16, #tpu.memory_space<vmem>>, %arg8: memref<256x256xbf16, #tpu.memory_space<vmem>>, %arg9: memref<1x256xf32, #tpu.memory_space<vmem>>, %arg10: memref<256x256xbf16, #tpu.memory_space<vmem>>, %arg11: memref<1x256xf32, #tpu.memory_space<vmem>>, %arg12: memref<1x40x256xf32, #tpu.memory_space<vmem>>, %arg13: memref<1x40x256xf32, #tpu.memory_space<vmem>>, %arg14: memref<1x40x256xbf16, #tpu.memory_space<vmem>>, %arg15: memref<1x40x256xbf16, #tpu.memory_space<vmem>>) attributes {dimension_semantics = [#tpu.dimension_semantics<parallel>, #tpu.dimension_semantics<parallel>], iteration_bounds = array<i64: 2, 1>, scalar_prefetch = 0 : i64, scratch_operands = 0 : i64, tpu.core_type = #tpu.core_type<tc>, window_params = [{transform_indices = @transform_0, window_bounds = array<i64: 1, 40, 128>}, {transform_indices = @transform_1, window_bounds = array<i64: 1, 40, 128>}, {transform_indices = @transform_2, window_bounds = array<i64: 1, 10, 128>}, {pipeline_mode = #tpu.pipeline_mode<synchronous>, transform_indices = @transform_3, window_bounds = array<i64: 128, 512>}, {pipeline_mode = #tpu.pipeline_mode<synchronous>, transform_indices = @transform_4, window_bounds = array<i64: 128, 512>}, {pipeline_mode = #tpu.pipeline_mode<synchronous>, transform_indices = @transform_5, window_bounds = array<i64: 128, 256>}, {pipeline_mode = #tpu.pipeline_mode<synchronous>, transform_indices = @transform_6, window_bounds = array<i64: 256, 256>}, {pipeline_mode = #tpu.pipeline_mode<synchronous>, transform_indices = @transform_7, window_bounds = array<i64: 1, 256>}, {pipeline_mode = #tpu.pipeline_mode<synchronous>, transform_indices = @transform_8, window_bounds = array<i64: 256, 256>}, {pipeline_mode = #tpu.pipeline_mode<synchronous>, transform_indices = @transform_9, window_bounds = array<i64: 1, 256>}, {transform_indices = @transform_10, window_bounds = array<i64: 1, 40, 256>}, {transform_indices = @transform_11, window_bounds = array<i64: 1, 40, 256>}, {transform_indices = @transform_12, window_bounds = array<i64: 1, 40, 256>}, {transform_indices = @transform_13, window_bounds = array<i64: 1, 40, 256>}]} {
    %c0 = arith.constant 0 : index
    %c0_0 = arith.constant 0 : index
    %c0_1 = arith.constant 0 : index
    %0 = vector.load %arg2[%c0, %c0_0, %c0_1] : memref<1x40x128xf32, #tpu.memory_space<vmem>>, vector<1x40x128xf32>
    %1 = vector.shape_cast %0 : vector<1x40x128xf32> to vector<40x128xf32>
    %2 = arith.truncf %1 : vector<40x128xf32> to vector<40x128xbf16>
    %c0_2 = arith.constant 0 : index
    %c0_3 = arith.constant 0 : index
    %3 = vector.load %arg5[%c0_2, %c0_3] : memref<128x512xbf16, #tpu.memory_space<vmem>>, vector<128x512xbf16>
    %cst = arith.constant dense<0.000000e+00> : vector<40x512xf32>
    %4 = tpu.matmul %2, %3, %cst {dimension_numbers = #tpu.dot_dimension_numbers<[1], [0], [0], [1], [0, 0, 1, 1], [], []>} : vector<40x128xbf16>, vector<128x512xbf16>, vector<40x512xf32> -> vector<40x512xf32>
    %c0_4 = arith.constant 0 : index
    %c0_5 = arith.constant 0 : index
    %c0_6 = arith.constant 0 : index
    %5 = vector.load %arg3[%c0_4, %c0_5, %c0_6] : memref<1x40x128xf32, #tpu.memory_space<vmem>>, vector<1x40x128xf32>
    %6 = vector.shape_cast %5 : vector<1x40x128xf32> to vector<40x128xf32>
    %7 = arith.truncf %6 : vector<40x128xf32> to vector<40x128xbf16>
    %c0_7 = arith.constant 0 : index
    %c0_8 = arith.constant 0 : index
    %8 = vector.load %arg6[%c0_7, %c0_8] : memref<128x512xbf16, #tpu.memory_space<vmem>>, vector<128x512xbf16>
    %cst_9 = arith.constant dense<0.000000e+00> : vector<40x512xf32>
    %9 = tpu.matmul %7, %8, %cst_9 {dimension_numbers = #tpu.dot_dimension_numbers<[1], [0], [0], [1], [0, 0, 1, 1], [], []>} : vector<40x128xbf16>, vector<128x512xbf16>, vector<40x512xf32> -> vector<40x512xf32>
    %10 = arith.addf %4, %9 : vector<40x512xf32>
    %11 = vector.extract_strided_slice %10 {offsets = [0, 0], sizes = [40, 256], strides = [1, 1]} : vector<40x512xf32> to vector<40x256xf32>
    %12 = vector.extract_strided_slice %10 {offsets = [0, 256], sizes = [40, 256], strides = [1, 1]} : vector<40x512xf32> to vector<40x256xf32>
    %13 = arith.mulf %11, %11 : vector<40x256xf32>
    %14 = arith.mulf %12, %12 : vector<40x256xf32>
    %15 = arith.addf %13, %14 : vector<40x256xf32>
    %cst_10 = arith.constant 9.99999996E-13 : f32
    %16 = vector.broadcast %cst_10 : f32 to vector<40x256xf32>
    %17 = arith.addf %15, %16 : vector<40x256xf32>
    %18 = math.log %17 : vector<40x256xf32>
    %cst_11 = arith.constant 5.000000e-01 : f32
    %19 = vector.broadcast %cst_11 : f32 to vector<40x256xf32>
    %20 = arith.mulf %19, %18 : vector<40x256xf32>
    %21 = arith.truncf %11 : vector<40x256xf32> to vector<40x256xbf16>
    %c0_12 = arith.constant 0 : index
    %c0_13 = arith.constant 0 : index
    %c0_14 = arith.constant 0 : index
    %22 = vector.load %arg14[%c0_12, %c0_13, %c0_14] : memref<1x40x256xbf16, #tpu.memory_space<vmem>>, vector<1x40x256xbf16>
    %23 = vector.shape_cast %22 : vector<1x40x256xbf16> to vector<40x256xbf16>
    %24 = vector.shape_cast %21 : vector<40x256xbf16> to vector<1x40x256xbf16>
    tpu.vector_store %arg14[%c0_12, %c0_13, %c0_14], %24 {strides = array<i32>} : memref<1x40x256xbf16, #tpu.memory_space<vmem>>, vector<1x40x256xbf16>,
    %25 = arith.truncf %12 : vector<40x256xf32> to vector<40x256xbf16>
    %c0_15 = arith.constant 0 : index
    %c0_16 = arith.constant 0 : index
    %c0_17 = arith.constant 0 : index
    %26 = vector.load %arg15[%c0_15, %c0_16, %c0_17] : memref<1x40x256xbf16, #tpu.memory_space<vmem>>, vector<1x40x256xbf16>
    %27 = vector.shape_cast %26 : vector<1x40x256xbf16> to vector<40x256xbf16>
    %28 = vector.shape_cast %25 : vector<40x256xbf16> to vector<1x40x256xbf16>
    tpu.vector_store %arg15[%c0_15, %c0_16, %c0_17], %28 {strides = array<i32>} : memref<1x40x256xbf16, #tpu.memory_space<vmem>>, vector<1x40x256xbf16>,
    %29 = tpu.iota {dimensions = array<i32: 0>} : vector<40x10xi32>
    %30 = tpu.iota {dimensions = array<i32: 1>} : vector<40x10xi32>
    %c4_i32 = arith.constant 4 : i32
    %31 = vector.broadcast %c4_i32 : i32 to vector<40x10xi32>
    %32 = arith.muli %30, %31 : vector<40x10xi32>
    %33 = arith.cmpi sge, %29, %32 : vector<40x10xi32>
    %c4_i32_18 = arith.constant 4 : i32
    %34 = vector.broadcast %c4_i32_18 : i32 to vector<40x10xi32>
    %35 = arith.addi %32, %34 : vector<40x10xi32>
    %36 = arith.cmpi slt, %29, %35 : vector<40x10xi32>
    %37 = arith.andi %33, %36 : vector<40x10xi1>
    %cst_19 = arith.constant 1.000000e+00 : f32
    %cst_20 = arith.constant 0.000000e+00 : f32
    %38 = vector.broadcast %cst_19 : f32 to vector<40x10xf32>
    %39 = vector.broadcast %cst_20 : f32 to vector<40x10xf32>
    %40 = arith.select %37, %38, %39 : vector<40x10xi1>, vector<40x10xf32>
    %41 = arith.truncf %40 : vector<40x10xf32> to vector<40x10xbf16>
    %c0_21 = arith.constant 0 : index
    %c0_22 = arith.constant 0 : index
    %c0_23 = arith.constant 0 : index
    %42 = vector.load %arg4[%c0_21, %c0_22, %c0_23] : memref<1x10x128xf32, #tpu.memory_space<vmem>>, vector<1x10x128xf32>
    %43 = vector.shape_cast %42 : vector<1x10x128xf32> to vector<10x128xf32>
    %44 = arith.truncf %43 : vector<10x128xf32> to vector<10x128xbf16>
    %cst_24 = arith.constant dense<0.000000e+00> : vector<40x128xf32>
    %45 = tpu.matmul %41, %44, %cst_24 {dimension_numbers = #tpu.dot_dimension_numbers<[1], [0], [0], [1], [0, 0, 1, 1], [], []>} : vector<40x10xbf16>, vector<10x128xbf16>, vector<40x128xf32> -> vector<40x128xf32>
    %46 = arith.truncf %45 : vector<40x128xf32> to vector<40x128xbf16>
    %c0_25 = arith.constant 0 : index
    %c0_26 = arith.constant 0 : index
    %47 = vector.load %arg7[%c0_25, %c0_26] : memref<128x256xbf16, #tpu.memory_space<vmem>>, vector<128x256xbf16>
    %cst_27 = arith.constant dense<0.000000e+00> : vector<40x256xf32>
    %48 = tpu.matmul %46, %47, %cst_27 {dimension_numbers = #tpu.dot_dimension_numbers<[1], [0], [0], [1], [0, 0, 1, 1], [], []>} : vector<40x128xbf16>, vector<128x256xbf16>, vector<40x256xf32> -> vector<40x256xf32>
    %49 = arith.truncf %20 : vector<40x256xf32> to vector<40x256xbf16>
    %c0_28 = arith.constant 0 : index
    %c0_29 = arith.constant 0 : index
    %50 = vector.load %arg8[%c0_28, %c0_29] : memref<256x256xbf16, #tpu.memory_space<vmem>>, vector<256x256xbf16>
    %cst_30 = arith.constant dense<0.000000e+00> : vector<40x256xf32>
    %51 = tpu.matmul %49, %50, %cst_30 {dimension_numbers = #tpu.dot_dimension_numbers<[1], [0], [0], [1], [0, 0, 1, 1], [], []>} : vector<40x256xbf16>, vector<256x256xbf16>, vector<40x256xf32> -> vector<40x256xf32>
    %52 = arith.addf %48, %51 : vector<40x256xf32>
    %c0_31 = arith.constant 0 : index
    %c0_32 = arith.constant 0 : index
    %53 = vector.load %arg9[%c0_31, %c0_32] : memref<1x256xf32, #tpu.memory_space<vmem>>, vector<1x256xf32>
    %54 = vector.broadcast %53 : vector<1x256xf32> to vector<40x256xf32>
    %55 = arith.addf %52, %54 : vector<40x256xf32>
    %cst_33 = arith.constant 0.000000e+00 : f32
    %56 = vector.broadcast %cst_33 : f32 to vector<40x256xf32>
    %57 = arith.maximumf %55, %56 : vector<40x256xf32>
    %58 = arith.truncf %57 : vector<40x256xf32> to vector<40x256xbf16>
    %c0_34 = arith.constant 0 : index
    %c0_35 = arith.constant 0 : index
    %59 = vector.load %arg10[%c0_34, %c0_35] : memref<256x256xbf16, #tpu.memory_space<vmem>>, vector<256x256xbf16>
    %cst_36 = arith.constant dense<0.000000e+00> : vector<40x256xf32>
    %60 = tpu.matmul %58, %59, %cst_36 {dimension_numbers = #tpu.dot_dimension_numbers<[1], [0], [0], [1], [0, 0, 1, 1], [], []>} : vector<40x256xbf16>, vector<256x256xbf16>, vector<40x256xf32> -> vector<40x256xf32>
    %c0_37 = arith.constant 0 : index
    %c0_38 = arith.constant 0 : index
    %61 = vector.load %arg11[%c0_37, %c0_38] : memref<1x256xf32, #tpu.memory_space<vmem>>, vector<1x256xf32>
    %62 = vector.broadcast %61 : vector<1x256xf32> to vector<40x256xf32>
    %63 = arith.addf %60, %62 : vector<40x256xf32>
    %c0_39 = arith.constant 0 : index
    %c0_40 = arith.constant 0 : index
    %c0_41 = arith.constant 0 : index
    %64 = vector.load %arg12[%c0_39, %c0_40, %c0_41] : memref<1x40x256xf32, #tpu.memory_space<vmem>>, vector<1x40x256xf32>
    %65 = vector.shape_cast %64 : vector<1x40x256xf32> to vector<40x256xf32>
    %66 = vector.shape_cast %63 : vector<40x256xf32> to vector<1x40x256xf32>
    tpu.vector_store %arg12[%c0_39, %c0_40, %c0_41], %66 {strides = array<i32>} : memref<1x40x256xf32, #tpu.memory_space<vmem>>, vector<1x40x256xf32>,
    %67 = arith.subf %20, %63 : vector<40x256xf32>
    %cst_42 = arith.constant -1.000000e+02 : f32
    %68 = vector.broadcast %cst_42 : f32 to vector<40x256xf32>
    %69 = arith.maximumf %67, %68 : vector<40x256xf32>
    %c0_43 = arith.constant 0 : index
    %c0_44 = arith.constant 0 : index
    %c0_45 = arith.constant 0 : index
    %70 = vector.load %arg13[%c0_43, %c0_44, %c0_45] : memref<1x40x256xf32, #tpu.memory_space<vmem>>, vector<1x40x256xf32>
    %71 = vector.shape_cast %70 : vector<1x40x256xf32> to vector<40x256xf32>
    %72 = vector.shape_cast %69 : vector<40x256xf32> to vector<1x40x256xf32>
    tpu.vector_store %arg13[%c0_43, %c0_44, %c0_45], %72 {strides = array<i32>} : memref<1x40x256xf32, #tpu.memory_space<vmem>>, vector<1x40x256xf32>,
    return
  }
  func.func @transform_0(%arg0: i32, %arg1: i32) -> (i32, i32, i32) {
    %c0_i32 = arith.constant 0 : i32
    %c0_i32_0 = arith.constant 0 : i32
    return %arg0, %arg1, %c0_i32 : i32, i32, i32
  }
  func.func @transform_1(%arg0: i32, %arg1: i32) -> (i32, i32, i32) {
    %c0_i32 = arith.constant 0 : i32
    %c0_i32_0 = arith.constant 0 : i32
    return %arg0, %arg1, %c0_i32 : i32, i32, i32
  }
  func.func @transform_2(%arg0: i32, %arg1: i32) -> (i32, i32, i32) {
    %c0_i32 = arith.constant 0 : i32
    %c0_i32_0 = arith.constant 0 : i32
    return %arg0, %arg1, %c0_i32 : i32, i32, i32
  }
  func.func @transform_3(%arg0: i32, %arg1: i32) -> (i32, i32) {
    %c0_i32 = arith.constant 0 : i32
    %c0_i32_0 = arith.constant 0 : i32
    %c0_i32_1 = arith.constant 0 : i32
    return %c0_i32, %c0_i32_0 : i32, i32
  }
  func.func @transform_4(%arg0: i32, %arg1: i32) -> (i32, i32) {
    %c0_i32 = arith.constant 0 : i32
    %c0_i32_0 = arith.constant 0 : i32
    %c0_i32_1 = arith.constant 0 : i32
    return %c0_i32, %c0_i32_0 : i32, i32
  }
  func.func @transform_5(%arg0: i32, %arg1: i32) -> (i32, i32) {
    %c0_i32 = arith.constant 0 : i32
    %c0_i32_0 = arith.constant 0 : i32
    %c0_i32_1 = arith.constant 0 : i32
    return %c0_i32, %c0_i32_0 : i32, i32
  }
  func.func @transform_6(%arg0: i32, %arg1: i32) -> (i32, i32) {
    %c0_i32 = arith.constant 0 : i32
    %c0_i32_0 = arith.constant 0 : i32
    %c0_i32_1 = arith.constant 0 : i32
    return %c0_i32, %c0_i32_0 : i32, i32
  }
  func.func @transform_7(%arg0: i32, %arg1: i32) -> (i32, i32) {
    %c0_i32 = arith.constant 0 : i32
    %c0_i32_0 = arith.constant 0 : i32
    %c0_i32_1 = arith.constant 0 : i32
    return %c0_i32, %c0_i32_0 : i32, i32
  }
  func.func @transform_8(%arg0: i32, %arg1: i32) -> (i32, i32) {
    %c0_i32 = arith.constant 0 : i32
    %c0_i32_0 = arith.constant 0 : i32
    %c0_i32_1 = arith.constant 0 : i32
    return %c0_i32, %c0_i32_0 : i32, i32
  }
  func.func @transform_9(%arg0: i32, %arg1: i32) -> (i32, i32) {
    %c0_i32 = arith.constant 0 : i32
    %c0_i32_0 = arith.constant 0 : i32
    %c0_i32_1 = arith.constant 0 : i32
    return %c0_i32, %c0_i32_0 : i32, i32
  }
  func.func @transform_10(%arg0: i32, %arg1: i32) -> (i32, i32, i32) {
    %c0_i32 = arith.constant 0 : i32
    %c0_i32_0 = arith.constant 0 : i32
    return %arg0, %arg1, %c0_i32 : i32, i32, i32
  }
  func.func @transform_11(%arg0: i32, %arg1: i32) -> (i32, i32, i32) {
    %c0_i32 = arith.constant 0 : i32
    %c0_i32_0 = arith.constant 0 : i32
    return %arg0, %arg1, %c0_i32 : i32, i32, i32
  }
  func.func @transform_12(%arg0: i32, %arg1: i32) -> (i32, i32, i32) {
    %c0_i32 = arith.constant 0 : i32
    %c0_i32_0 = arith.constant 0 : i32
    return %arg0, %arg1, %c0_i32 : i32, i32, i32
  }
  func.func @transform_13(%arg0: i32, %arg1: i32) -> (i32, i32, i32) {
    %c0_i32 = arith.constant 0 : i32
    %c0_i32_0 = arith.constant 0 : i32
    return %arg0, %arg1, %c0_i32 : i32, i32, i32
  }
}

</mosaic_0001>

<bundles_post_ra>
// kernel: _lambda_.3
= control target key start
LH: loop header
LB: loop body
LE: loop exit
PB: predicated region body
PF: predicated region fallthrough
CT: control target
= control target key end

     0   :  { %s570_s12 = smov 0   ;;  %s654_s0 = inlined_call_operand.vmem [shape: f32[2,36,256], index: 0, kind: input, shape index: {}]   ;;  %s655_s1 = inlined_call_operand.vmem [shape: bf16[256,128], index: 1, kind: input, shape index: {}]   ;;  %s656_s2 = inlined_call_operand.vmem [shape: f32[1,128], index: 2, kind: input, shape index: {}]   ;;  %s657_s3 = inlined_call_operand.vmem [shape: f32[2,1,128], index: 3, kind: output, shape index: {}]  }
   0x1 LB: > { %s442_s13 = sadd.s32 4294967295, %s548_s12   ;;  %p446_p0 = scmp.ge.s32.totalorder %s548_s12, 1  ;;  %s548_s12 = sphi %s570_s12, %s13_s12  }
   0x2   : > { %p137_p1 = scmp.lt.s32.totalorder %s548_s12, 3 }
   0x4   : > { %p138_p2 = pnand %p446_p0, %p137_p1 }
   0x5   : > { %v526_v0 = vld [vmem:[%s655_s1 + $0x40] sm:$0xff] (!%p138_p2)   ;;  %p159_p3 = scmp.lt.s32.totalorder (!%p138_p2), %s442_s13, 1  ;;  %v528_v2 = vld [vmem:[%s655_s1 + $0x48] sm:$0xff] (!%p138_p2)   ;;  %v530_v4 = vld [vmem:[%s655_s1 + $0x50] sm:$0xff] (!%p138_p2)   ;;  %vm383_vm0 = vcmask (!%p138_p2), 1043456  }
   0x6   : > { %141 = sbr.rel (%p138_p2) target bundleno = 283 (0x11b), region = 32  ;;  %v527_v1 = vld [vmem:[%s655_s1] sm:$0xff] (!%p138_p2)   ;;  %467 = vmatprep.subr.bf16.mxu0 (!%p138_p2), %v526_v0  ;;  %501 = vmatprep.subr.bf16.mxu1 (!%p138_p2), %v526_v0  ;;  %v529_v3 = vld [vmem:[%s655_s1 + $0x8] sm:$0xff] (!%p138_p2)   ;;  %v531_v5 = vld [vmem:[%s655_s1 + $0x10] sm:$0xff] (!%p138_p2)  }
   0x7   : > { %468 = vmatpush3.bf16.msra.mxu0 (!%p138_p2), %v527_v1  ;;  %509 = vmatpush3.bf16.msra.mxu1 (!%p138_p2), %v527_v1  ;;  %v532_v6 = vld [vmem:[%s655_s1 + $0x58] sm:$0xff] (!%p138_p2)   ;;  %v534_v8 = vld [vmem:[%s655_s1 + $0x60] sm:$0xff] (!%p138_p2)   ;;  %v536_v10 = vld [vmem:[%s655_s1 + $0x68] sm:$0xff] (!%p138_p2)  }
   0x8   : > { %469 = vmatprep.subr.bf16.mxu0 (!%p138_p2), %v528_v2  ;;  %502 = vmatprep.subr.bf16.mxu1 (!%p138_p2), %v528_v2  ;;  %v533_v7 = vld [vmem:[%s655_s1 + $0x18] sm:$0xff] (!%p138_p2)   ;;  %v535_v9 = vld [vmem:[%s655_s1 + $0x20] sm:$0xff] (!%p138_p2)   ;;  %v537_v17 = vld [vmem:[%s655_s1 + $0x28] sm:$0xff] (!%p138_p2)  }
   0x9   : > { %v538_v18 = vld [vmem:[%s655_s1 + $0x70] sm:$0xff] (!%p138_p2)   ;;  %v540_v20 = vld [vmem:[%s655_s1 + $0x78] sm:$0xff] (!%p138_p2)   ;;  %v448_v34 = vld [vmem:[%s656_s2] ss:$0 sm:$0xff] (!%p138_p2) }
   0xa   : > { %v539_v19 = vld [vmem:[%s655_s1 + $0x30] sm:$0xff] (!%p138_p2)   ;;  %v541_v21 = vld [vmem:[%s655_s1 + $0x38] sm:$0xff] (!%p138_p2)  }
   0xb   : > { %470 = vmatpush3.bf16.msra.mxu0 (!%p138_p2), %v529_v3  ;;  %510 = vmatpush3.bf16.msra.mxu1 (!%p138_p2), %v529_v3 }
   0xc   : > { %471 = vmatprep.subr.bf16.mxu0 (!%p138_p2), %v530_v4  ;;  %503 = vmatprep.subr.bf16.mxu1 (!%p138_p2), %v530_v4 }
   0xd   : > { %s659_s13 = smov (!%p159_p3, %s442_s13), 1 }
   0xe   : > { %s517_s28 = smul.u32 80, %s659_s13  ;;  %s166_s29 = scalar_lea.vmem %s657_s3, %s659_s13 }
   0xf   : > { %472 = vmatpush3.bf16.msra.mxu0 %v531_v5  ;;  %511 = vmatpush3.bf16.msra.mxu1 %v531_v5 }
  0x10   : > { %473 = vmatprep.subr.bf16.mxu0 %v532_v6  ;;  %504 = vmatprep.subr.bf16.mxu1 %v532_v6  ;;  %s611_s8 = scalar_lea.vmem %s654_s0, %s517_s28 }
  0x11   : > { %v169_v11 = vld [vmem:[%s611_s8 + $0x8] sm:$0xff]  ;;  %v171_v12 = vld [vmem:[%s611_s8 + $0x18] sm:$0xff]  ;;  %v168_v22 = vld [vmem:[%s611_s8] sm:$0xff] }
  0x12   : > { %v173_v13 = vld [vmem:[%s611_s8 + $0x28] sm:$0xff]  ;;  %v179_v14 = vpack.c.bf16 %v171_v12, %v169_v11  ;;  %v175_v15 = vld [vmem:[%s611_s8 + $0x38] sm:$0xff]  ;;  %v170_v23 = vld [vmem:[%s611_s8 + $0x10] sm:$0xff] }
  0x13   : > { %474 = vmatpush3.bf16.msra.mxu0 %v533_v7  ;;  %512 = vmatpush3.bf16.msra.mxu1 %v533_v7  ;;  %v181_v16 = vpack.c.bf16 %v175_v15, %v173_v13  ;;  %v172_v24 = vld [vmem:[%s611_s8 + $0x20] sm:$0xff]  ;;  %v174_v25 = vld [vmem:[%s611_s8 + $0x30] sm:$0xff]  ;;  %v177_v26 = vld [vmem:[%s611_s8 + $0x48] sm:$0xf]  ;;  %v178_v27 = vpack.c.bf16 %v170_v23, %v168_v22 }
  0x14   : > { %475 = vmatprep.subr.bf16.mxu0 %v534_v8  ;;  %505 = vmatprep.subr.bf16.mxu1 %v534_v8  ;;  %v180_v28 = vpack.c.bf16 %v174_v25, %v172_v24  ;;  %v183_v29 = vpack.c.bf16 %v177_v26, %v177_v26  ;;  %v176_v30 = vld [vmem:[%s611_s8 + $0x40] sm:$0xf] }
  0x15   : > { %351 = vmatprep.mubr.bf16.mxu0 %v179_v14  ;;  %359 = vmatprep.mubr.bf16.mxu1 %v181_v16  ;;  %v182_v31 = vpack.c.bf16 %v176_v30, %v176_v30 }
  0x17   : > { %476 = vmatpush3.bf16.msra.mxu0 %v535_v9  ;;  %513 = vmatpush3.bf16.msra.mxu1 %v535_v9 }
  0x18   : > { %477 = vmatprep.subr.bf16.mxu0 %v536_v10  ;;  %506 = vmatprep.subr.bf16.mxu1 %v536_v10 }
  0x1b   : > { %478 = vmatpush3.bf16.msra.mxu0 %v537_v17  ;;  %514 = vmatpush3.bf16.msra.mxu1 %v537_v17 }
  0x1c   : > { %479 = vmatprep.subr.bf16.mxu0 %v538_v18  ;;  %507 = vmatprep.subr.bf16.mxu1 %v538_v18 }
  0x1f   : > { %480 = vmatpush3.bf16.msra.mxu0 %v539_v19  ;;  %515 = vmatpush3.bf16.msra.mxu1 %v539_v19 }
  0x20   : > { %481 = vmatprep.subr.bf16.mxu0 %v540_v20  ;;  %508 = vmatprep.subr.bf16.mxu1 %v540_v20 }
  0x23   : > { %482 = vmatpush3.bf16.msra.mxu0 %v541_v21  ;;  %516 = vmatpush3.bf16.msra.mxu1 %v541_v21 }
  0x26   : > { %352 = vmatmul.mubr.bf16.vlgmr.msra.gmra.mrb[0].mxu0 %v178_v27  ;;  %360 = vmatmul.mubr.bf16.vlgmr.msra.gmra.mrb[0].mxu1 %v180_v28 }
  0x27   : > { %367 = vmatprep.mubr.bf16.mxu1 %v183_v29 }
  0x2e   : > { %368 = vmatmul.mubr.bf16.gmra.mrb[4].mxu1 %v182_v31 }
  0xf9   : > { %v483_v32 = vpop.f32.mrb[0].mxu0  ;;  %v489_v33 = vpop.f32.mrb[0].mxu1 }
  0xfa   : > { %v484_v35 = vpop.f32.mrb[1].mxu0  ;;  %v490_v36 = vpop.f32.mrb[1].mxu1 }
  0xfb   : > { %v485_v37 = vadd.f32 %v484_v35, %v483_v32  ;;  %v491_v38 = vadd.f32 %v490_v36, %v489_v33  ;;  %v486_v39 = vpop.f32.mrb[2].mxu0  ;;  %v492_v40 = vpop.f32.mrb[2].mxu1 }
  0xfc   : > { %v487_v41 = vpop.f32.mrb[3].mxu0  ;;  %v493_v42 = vpop.f32.mrb[3].mxu1 }
  0xfd   : > { %v354_v43 = vadd.f32 %v485_v37, %v448_v34  ;;  %v488_v44 = vadd.f32 %v487_v41, %v486_v39  ;;  %v494_v45 = vadd.f32 %v493_v42, %v492_v40  ;;  %v362_v46 = vadd.f32 %v491_v38, %v448_v34 }
  0xff   : > { %v357_v47 = vadd.f32 %v488_v44, %v448_v34  ;;  %v375_v48 = vmax.f32 %v354_v43, 0.0  ;;  %v365_v50 = vadd.f32 %v494_v45, %v448_v34  ;;  %v377_v53 = vmax.f32 %v362_v46, 0.0 }
 0x101   : > { %v376_v49 = vmax.f32 %v357_v47, 0.0  ;;  %v495_v51 = vpop.f32.mrb[4].mxu1  ;;  %v378_v58 = vmax.f32 %v365_v50, 0.0 }
 0x102   : > { %v496_v52 = vpop.f32.mrb[5].mxu1 }
 0x103   : > { %v380_v54 = vadd.f32 %v376_v49, %v375_v48  ;;  %v497_v55 = vadd.f32 %v496_v52, %v495_v51  ;;  %v498_v56 = vpop.f32.mrb[6].mxu1 }
 0x104   : > { %v499_v57 = vpop.f32.mrb[7].mxu1 }
 0x105   : > { %v381_v59 = vadd.f32 %v380_v54, %v377_v53  ;;  %v370_v60 = vadd.f32 %v497_v55, %v448_v34 }
 0x107   : > { %v382_v61 = vadd.f32 %v381_v59, %v378_v58  ;;  %v379_v62 = vmax.f32 %v370_v60, 0.0 }
 0x109   : > { %v384_v63 = vsel %vm383_vm0, %v379_v62, 0.0 }
 0x10a   : > { %v385_v0 = vadd.f32 %v384_v63, %v382_v61 }
 0x10c   : > { %v386_v1 = vrot.slane %v385_v0, 4 }
 0x10e   : > { %v387_v2 = vadd.f32 %v386_v1, %v385_v0 }
 0x110   : > { %v388_v3 = vrot.slane %v387_v2, 2 }
 0x112   : > { %v389_v4 = vadd.f32 %v388_v3, %v387_v2 }
 0x114   : > { %v390_v5 = vrot.slane %v389_v4, 1 }
 0x116   : > { %v391_v6 = vadd.f32 %v390_v5, %v389_v4 }
 0x118   : > { %v393_v7 = vmul.f32 0.027777778, %v391_v6 }
 0x11a   : > { %394 = vst [vmem:[%s166_s29] sm:$0x1] %v393_v7 }
 0x11b PF: > { %s13_s12 = sadd.s32 1, %s548_s12  }
 0x11c   : > { %p10_p4 = scmp.ge.s32.totalorder %s13_s12, 4  }
 0x11e   :  { %12 = sbr.rel (!%p10_p4) target bundleno = 1 (0x1), region = 62 }

// kernel: _lambda_.4
= control target key start
LH: loop header
LB: loop body
LE: loop exit
PB: predicated region body
PF: predicated region fallthrough
CT: control target
= control target key end

     0   :  { %s943_s21 = smov 0   ;;  %s1086_s0 = inlined_call_operand.vmem [shape: f32[2,4,400], index: 0, kind: input, shape index: {}]   ;;  %s1087_s1 = inlined_call_operand.vmem [shape: f32[2,1,128], index: 1, kind: input, shape index: {}]   ;;  %s1088_s2 = inlined_call_operand.vmem [shape: bf16[400,128], index: 2, kind: input, shape index: {}]   ;;  %s1089_s3 = inlined_call_operand.vmem [shape: f32[1,128], index: 3, kind: input, shape index: {}, may-alias: {3,5}]   ;;  %s1090_s4 = inlined_call_operand.vmem [shape: bf16[128,128], index: 4, kind: input, shape index: {}]   ;;  %s1091_s5 = inlined_call_operand.vmem [shape: f32[1,128], index: 5, kind: input, shape index: {}, may-alias: {3,5}]   ;;  %s1092_s6 = inlined_call_operand.vmem [shape: f32[2,4,128], index: 6, kind: output, shape index: {}]  }
   0x1 LB: > { %s752_s22 = sadd.s32 4294967295, %s903_s21   ;;  %p756_p0 = scmp.ge.s32.totalorder %s903_s21, 1  ;;  %s903_s21 = sphi %s943_s21, %s16_s21  }
   0x2   : > { %p220_p1 = scmp.lt.s32.totalorder %s903_s21, 3 }
   0x4   : > { %p221_p2 = pnand %p756_p0, %p220_p1 }
   0x5   : > { %v862_v0 = vld [vmem:[%s1088_s2 + $0x40] sm:$0xff] (!%p221_p2)   ;;  %v905_v1 = vmov (!%p221_p2), 0   ;;  %v865_v4 = vld [vmem:[%s1088_s2 + $0x48] sm:$0xff] (!%p221_p2)   ;;  %v868_v7 = vld [vmem:[%s1088_s2 + $0x50] sm:$0xff] (!%p221_p2)   ;;  %p252_p3 = scmp.lt.s32.totalorder (!%p221_p2), %s752_s22, 1  ;;  %vm484_vm0 = vcmask (!%p221_p2), 130048  }
   0x6   : > { %224 = sbr.rel (%p221_p2) target bundleno = 479 (0x1df), region = 44  ;;  %528 = vmatprep.subr.bf16.mxu1 (!%p221_p2), %v905_v1  ;;  %v863_v2 = vld [vmem:[%s1088_s2 + $0x80] sm:$0xff] (!%p221_p2)   ;;  %800 = vmatprep.subr.bf16.mxu0 (!%p221_p2), %v862_v0  ;;  %v866_v5 = vld [vmem:[%s1088_s2 + $0x88] sm:$0xff] (!%p221_p2)   ;;  %v869_v8 = vld [vmem:[%s1088_s2 + $0x90] sm:$0xff] (!%p221_p2)   ;;  %v906_v34 = vmov (!%p221_p2), 0.0   ;;  %vm907_vm1 = vmmov (!%p221_p2), 0  }
   0x7   : > { %v864_v3 = vld [vmem:[%s1088_s2] sm:$0xff] (!%p221_p2)   ;;  %529 = vmatpush1.bf16.msra.mxu1 (!%p221_p2), %v863_v2  ;;  %v867_v6 = vld [vmem:[%s1088_s2 + $0x8] sm:$0xff] (!%p221_p2)   ;;  %v870_v9 = vld [vmem:[%s1088_s2 + $0x10] sm:$0xff] (!%p221_p2)  }
   0x8   : > { %801 = vmatpush3.bf16.msra.mxu0 (!%p221_p2), %v864_v3  ;;  %530 = vmatprep.subr.bf16.mxu1 (!%p221_p2), %v905_v1  ;;  %v871_v10 = vld [vmem:[%s1088_s2 + $0x58] sm:$0xff] (!%p221_p2)   ;;  %v874_v13 = vld [vmem:[%s1088_s2 + $0x60] sm:$0xff] (!%p221_p2)   ;;  %v877_v16 = vld [vmem:[%s1088_s2 + $0x68] sm:$0xff] (!%p221_p2)  }
   0x9   : > { %802 = vmatprep.subr.bf16.mxu0 (!%p221_p2), %v865_v4  ;;  %v872_v11 = vld [vmem:[%s1088_s2 + $0x98] sm:$0xff] (!%p221_p2)   ;;  %v875_v14 = vld [vmem:[%s1088_s2 + $0xa0] sm:$0xff] (!%p221_p2)   ;;  %v878_v17 = vld [vmem:[%s1088_s2 + $0xa8] sm:$0xff] (!%p221_p2)  }
   0xa   : > { %v873_v12 = vld [vmem:[%s1088_s2 + $0x18] sm:$0xff] (!%p221_p2)   ;;  %v876_v15 = vld [vmem:[%s1088_s2 + $0x20] sm:$0xff] (!%p221_p2)   ;;  %v879_v18 = vld [vmem:[%s1088_s2 + $0x28] sm:$0xff] (!%p221_p2)  }
   0xb   : > { %531 = vmatpush1.bf16.msra.mxu1 (!%p221_p2), %v866_v5  ;;  %v880_v19 = vld [vmem:[%s1088_s2 + $0x70] sm:$0xff] (!%p221_p2)   ;;  %v883_v23 = vld [vmem:[%s1088_s2 + $0x78] sm:$0xff] (!%p221_p2)   ;;  %v887_v31 = vld [vmem:[%s1088_s2 + $0xc0] sm:$0xff] (!%p221_p2)  }
   0xc   : > { %803 = vmatpush3.bf16.msra.mxu0 (!%p221_p2), %v867_v6  ;;  %532 = vmatprep.subr.bf16.mxu1 (!%p221_p2), %v905_v1  ;;  %v881_v20 = vld [vmem:[%s1088_s2 + $0xb0] sm:$0xff] (!%p221_p2)   ;;  %v884_v27 = vld [vmem:[%s1088_s2 + $0xb8] sm:$0xff] (!%p221_p2)   ;;  %v889_v33 = vld [vmem:[%s1090_s4] sm:$0xff] (!%p221_p2)  }
   0xd   : > { %804 = vmatprep.subr.bf16.mxu0 %v868_v7  ;;  %s1094_s22 = smov (!%p252_p3, %s752_s22), 1  ;;  %v882_v21 = vld [vmem:[%s1088_s2 + $0x30] sm:$0xff]   ;;  %v885_v29 = vld [vmem:[%s1088_s2 + $0x38] sm:$0xff]   ;;  %v890_v36 = vld [vmem:[%s1090_s4 + $0x8] sm:$0xff]  }
   0xe   : > { %s799_s9 = sshll.u32 %s1094_s22, 4  ;;  %v891_v37 = vld [vmem:[%s1090_s4 + $0x10] sm:$0xff]   ;;  %v892_v38 = vld [vmem:[%s1090_s4 + $0x18] sm:$0xff]   ;;  %v893_v39 = vld [vmem:[%s1090_s4 + $0x20] sm:$0xff]   ;;  %s259_s7 = scalar_lea.vmem %s1087_s1, %s1094_s22 }
   0xf   : > { %533 = vmatpush1.bf16.msra.mxu1 %v869_v8  ;;  %s256_s18 = scalar_lea.vmem %s1086_s0, %s799_s9  ;;  %v894_v40 = vld [vmem:[%s1090_s4 + $0x28] sm:$0xff]   ;;  %v895_v41 = vld [vmem:[%s1090_s4 + $0x30] sm:$0xff]   ;;  %v896_v42 = vld [vmem:[%s1090_s4 + $0x38] sm:$0xff]   ;;  %s759_s8 = sshll.u32 %s1094_s22, 2 }
  0x10   : > { %805 = vmatpush3.bf16.msra.mxu0 %v870_v9  ;;  %534 = vmatprep.subr.bf16.mxu1 %v905_v1  ;;  %v265_v22 = vld [vmem:[%s256_s18] sm:$0xff]  ;;  %v266_v25 = vld [vmem:[%s256_s18 + $0x8] sm:$0xff]  ;;  %s263_s13 = scalar_lea.vmem %s1092_s6, %s759_s8 }
  0x11   : > { %806 = vmatprep.subr.bf16.mxu0 %v871_v10  ;;  %v269_v24 = vcombine.high %v265_v22, %v265_v22  ;;  %v270_v26 = vcombine.high %v266_v25, %v266_v25  ;;  %v273_v32 = vpack.c.bf16 %v265_v22, %v265_v22  ;;  %v275_v35 = vpack.c.bf16 %v266_v25, %v266_v25  ;;  %v760_v45 = vld [vmem:[%s1089_s3] ss:$0 sm:$0xff] }
  0x12   : > { %v787_v55 = vld [vmem:[%s259_s7] ss:$0 sm:$0xff] }
  0x13   : > { %535 = vmatpush1.bf16.msra.mxu1 %v872_v11  ;;  %v274_v28 = vpack.c.bf16 %v269_v24, %v269_v24  ;;  %v276_v30 = vpack.c.bf16 %v270_v26, %v270_v26  ;;  %v788_v59 = vld [vmem:[%s1091_s5] ss:$0 sm:$0xff] }
  0x14   : > { %807 = vmatpush3.bf16.msra.mxu0 %v873_v12  ;;  %536 = vmatprep.subr.bf16.mxu1 %v905_v1 }
  0x15   : > { %808 = vmatprep.subr.bf16.mxu0 %v874_v13  ;;  %520 = vmatprep.mubr.bf16.mxu0 %v274_v28 }
  0x16   : > { %786 = vmatprep.mubr.msk.bf16.mxu1 %vm484_vm0, %v276_v30 }
  0x17   : > { %537 = vmatpush1.bf16.msra.mxu1 %v875_v14 }
  0x18   : > { %809 = vmatpush3.bf16.msra.mxu0 %v876_v15  ;;  %538 = vmatprep.subr.bf16.mxu1 %v905_v1 }
  0x19   : > { %810 = vmatprep.subr.bf16.mxu0 %v877_v16 }
  0x1b   : > { %539 = vmatpush1.bf16.msra.mxu1 %v878_v17 }
  0x1c   : > { %811 = vmatpush3.bf16.msra.mxu0 %v879_v18  ;;  %540 = vmatprep.subr.bf16.mxu1 %v905_v1 }
  0x1d   : > { %812 = vmatprep.subr.bf16.mxu0 %v880_v19 }
  0x1f   : > { %541 = vmatpush1.bf16.msra.mxu1 %v881_v20 }
  0x20   : > { %813 = vmatpush3.bf16.msra.mxu0 %v882_v21  ;;  %542 = vmatprep.subr.bf16.mxu1 %v905_v1 }
  0x21   : > { %814 = vmatprep.subr.bf16.mxu0 %v883_v23 }
  0x23   : > { %543 = vmatpush1.bf16.msra.mxu1 %v884_v27 }
  0x24   : > { %815 = vmatpush3.bf16.msra.mxu0 %v885_v29  ;;  %544 = vmatprep.subr.bf16.mxu1 %v905_v1 }
  0x25   : > { %831 = vmatprep.subr.bf16.mxu0 %v906_v34 }
  0x27   : > { %521 = vmatmul.mubr.bf16.vlgmr.msra.gmra.mrb[0].mxu0 %v273_v32  ;;  %545 = vmatpush1.bf16.msra.mxu1 %v887_v31 }
  0x28   : > { %832 = vmatpush3.bf16.msra.mxu0 %v889_v33  ;;  %847 = vmatprep.mubr.msk.bf16.mxu0 %vm907_vm1, %v906_v34 }
  0x29   : > { %833 = vmatprep.subr.bf16.mxu0 %v906_v34 }
  0x2a   : > { %561 = vmatmul.mubr.bf16.vlgmr.msra.gmra.mrb[0].mxu1 %v275_v35 }
  0x2c   : > { %834 = vmatpush3.bf16.msra.mxu0 %v890_v36 }
  0x2d   : > { %835 = vmatprep.subr.bf16.mxu0 %v906_v34 }
  0x30   : > { %836 = vmatpush3.bf16.msra.mxu0 %v891_v37 }
  0x31   : > { %837 = vmatprep.subr.bf16.mxu0 %v906_v34 }
  0x34   : > { %838 = vmatpush3.bf16.msra.mxu0 %v892_v38 }
  0x35   : > { %839 = vmatprep.subr.bf16.mxu0 %v906_v34 }
  0x38   : > { %840 = vmatpush3.bf16.msra.mxu0 %v893_v39 }
  0x39   : > { %841 = vmatprep.subr.bf16.mxu0 %v906_v34 }
  0x3c   : > { %842 = vmatpush3.bf16.msra.mxu0 %v894_v40 }
  0x3d   : > { %843 = vmatprep.subr.bf16.mxu0 %v906_v34 }
  0x40   : > { %844 = vmatpush3.bf16.msra.mxu0 %v895_v41 }
  0x41   : > { %845 = vmatprep.subr.bf16.mxu0 %v906_v34 }
  0x44   : > { %846 = vmatpush3.bf16.msra.mxu0 %v896_v42 }
  0xfa   : > { %v816_v43 = vpop.f32.mrb[0].mxu0 }
  0xfb   : > { %v817_v44 = vpop.f32.mrb[1].mxu0 }
  0xfc   : > { %v818_v46 = vadd.f32 %v817_v44, %v816_v43  ;;  %v819_v47 = vpop.f32.mrb[2].mxu0 }
  0xfd   : > { %v820_v48 = vpop.f32.mrb[3].mxu0  ;;  %v562_v49 = vpop.f32.mrb[0].mxu1 }
  0xfe   : > { %v523_v50 = vadd.f32 %v818_v46, %v760_v45  ;;  %v564_v51 = vpop.f32.mrb[1].mxu1 }
  0xff   : > { %v565_v52 = vpop.f32.mrb[2].mxu1 }
 0x100   : > { %v563_v53 = vadd.f32 %v562_v49, %v523_v50  ;;  %v566_v54 = vpop.f32.mrb[3].mxu1 }
 0x102   : > { %v568_v56 = vmax.f32 %v563_v53, 0.0 }
 0x104   : > { %v576_v57 = vadd.f32 %v787_v55, %v568_v56 }
 0x106   : > { %v577_v58 = vpack.c.bf16 %v576_v57, %v576_v57 }
 0x108   : > { %848 = vmatmul.mubr.bf16.vlgmr.msra.gmra.mrb[4].mxu0 %v577_v58 }
 0x1db   : > { %v683_v60 = vpop.f32.mrb[4].mxu0 }
 0x1dc   : > { %v684_v61 = vadd.f32 %v788_v59, %v683_v60  ;;  %v849_v62 = vpop.f32.mrb[5].mxu0 }
 0x1dd   : > { %v686_v63 = vpop.f32.mrb[6].mxu0 }
 0x1de   : > { %689 = vst [vmem:[%s263_s13] sm:$0xf] %v684_v61  ;;  %v850_v0 = vpop.f32.mrb[7].mxu0 }
 0x1df PF: > { %s16_s21 = sadd.s32 1, %s903_s21  }
 0x1e0   : > { %p13_p4 = scmp.ge.s32.totalorder %s16_s21, 4  }
 0x1e2   :  { %15 = sbr.rel (!%p13_p4) target bundleno = 1 (0x1), region = 77 }

// kernel: _lambda_.5
= control target key start
LH: loop header
LB: loop body
LE: loop exit
PB: predicated region body
PF: predicated region fallthrough
CT: control target
= control target key end

     0   :  { %s3179_s25 = smov 0   ;;  %s3181_s26 = smov 0   ;;  %s3847_s0 = inlined_call_operand.vmem [shape: f32[2,40,128], index: 0, kind: input, shape index: {}]   ;;  %s3848_s1 = inlined_call_operand.vmem [shape: f32[2,40,128], index: 1, kind: input, shape index: {}]   ;;  %s3849_s2 = inlined_call_operand.vmem [shape: f32[2,10,128], index: 2, kind: input, shape index: {}]   ;;  %s3850_s3 = inlined_call_operand.vmem [shape: bf16[128,512], index: 3, kind: input, shape index: {}]   ;;  %s3851_s4 = inlined_call_operand.vmem [shape: bf16[128,512], index: 4, kind: input, shape index: {}]   ;;  %s3852_s5 = inlined_call_operand.vmem [shape: bf16[128,256], index: 5, kind: input, shape index: {}]   ;;  %s3853_s6 = inlined_call_operand.vmem [shape: bf16[256,256], index: 6, kind: input, shape index: {}]   ;;  %s3854_s7 = inlined_call_operand.vmem [shape: f32[1,256], index: 7, kind: input, shape index: {}, may-alias: {7,9}]   ;;  %s3855_s8 = inlined_call_operand.vmem [shape: bf16[256,256], index: 8, kind: input, shape index: {}]   ;;  %s3856_s9 = inlined_call_operand.vmem [shape: f32[1,256], index: 9, kind: input, shape index: {}, may-alias: {7,9}]   ;;  %s3857_s10 = inlined_call_operand.vmem [shape: f32[2,40,256], index: 10, kind: output, shape index: {0}]   ;;  %s3858_s11 = inlined_call_operand.vmem [shape: f32[2,40,256], index: 11, kind: output, shape index: {1}]   ;;  %s3859_s12 = inlined_call_operand.vmem [shape: bf16[2,40,256], index: 12, kind: output, shape index: {2}]   ;;  %s3860_s13 = inlined_call_operand.vmem [shape: bf16[2,40,256], index: 13, kind: output, shape index: {3}]  }
   0x1   :  { %s3183_s27 = smov 0  }
   0x2 LB: > { %s36_s28 = sadd.s32 1, %s3100_s26  ;;  %p2588_p0 = scmp.ge.s32.totalorder %s3104_s27, 1  ;;  %s3104_s27 = sphi %s3183_s27, %s24_s27   ;;  %s3100_s26 = sphi %s3181_s26, %s3866_s26   ;;  %s3096_s25 = sphi %s3179_s25, %s3865_s25  }
   0x3   : > { %p38_p1 = scmp.ge.s32.totalorder %s36_s28, 2  ;;  %p455_p2 = scmp.lt.s32.totalorder %s3104_s27, 3 }
   0x5   : > { %s3868_s28 = smov (%p38_p1, %s36_s28), 0  ;;  %p456_p3 = pnand %p2588_p0, %p455_p2 }
   0x6   : > { %v2846_v0 = vld [vmem:[%s3851_s4 + $0x4] ss:$16 sps:$4 sm:$0xff] (!%p456_p3)   ;;  %v2848_v1 = vld [vmem:[%s3851_s4 + $0xc] ss:$16 sps:$4 sm:$0xff] (!%p456_p3)   ;;  %v3106_v2 = vmov (!%p456_p3), 0   ;;  %p557_p4 = scmp.lt.s32.totalorder (!%p456_p3), %s3096_s25, 1 }
   0x7   : > { %459 = sbr.rel (%p456_p3) target bundleno = 802 (0x322), region = 60  ;;  %903 = vmatprep.mubr.bf16.mxu0 (!%p456_p3), %v3106_v2  ;;  %964 = vmatprep.mubr.bf16.mxu1 (!%p456_p3), %v3106_v2  ;;  %v2850_v3 = vld [vmem:[%s3851_s4] ss:$16 sps:$4 sm:$0xff] (!%p456_p3)   ;;  %v2851_v4 = vld [vmem:[%s3851_s4 + $0x8] ss:$16 sps:$4 sm:$0xff] (!%p456_p3)   ;;  %vm1465_vm0 = vcmask (!%p456_p3), 1044480  }
   0x8   : > { %871 = vmatprep.subr.bf16.mxu0 (!%p456_p3), %v2846_v0  ;;  %932 = vmatprep.subr.bf16.mxu1 (!%p456_p3), %v2848_v1  ;;  %v2852_v5 = vld [vmem:[%s3851_s4 + $0x24] ss:$16 sps:$4 sm:$0xff] (!%p456_p3)   ;;  %v2854_v6 = vld [vmem:[%s3851_s4 + $0x2c] ss:$16 sps:$4 sm:$0xff] (!%p456_p3)   ;;  %v2856_v7 = vld [vmem:[%s3851_s4 + $0x20] ss:$16 sps:$4 sm:$0xff] (!%p456_p3)  }
   0x9   : > { %872 = vmatpush1.bf16.msra.mxu0 (!%p456_p3), %v2850_v3  ;;  %933 = vmatpush1.bf16.msra.mxu1 (!%p456_p3), %v2851_v4  ;;  %v2857_v8 = vld [vmem:[%s3851_s4 + $0x28] ss:$16 sps:$4 sm:$0xff] (!%p456_p3)   ;;  %v2858_v9 = vld [vmem:[%s3851_s4 + $0x44] ss:$16 sps:$4 sm:$0xff] (!%p456_p3)   ;;  %v2860_v10 = vld [vmem:[%s3851_s4 + $0x4c] ss:$16 sps:$4 sm:$0xff] (!%p456_p3)   ;;  %v1419_v4 = vlaneseq (!%p456_p3) }
   0xa   : > { %873 = vmatprep.subr.bf16.mxu0 (!%p456_p3), %v2852_v5  ;;  %934 = vmatprep.subr.bf16.mxu1 (!%p456_p3), %v2854_v6  ;;  %v2862_v11 = vld [vmem:[%s3851_s4 + $0x40] ss:$16 sps:$4 sm:$0xff] (!%p456_p3)   ;;  %v2863_v12 = vld [vmem:[%s3851_s4 + $0x48] ss:$16 sps:$4 sm:$0xff] (!%p456_p3)   ;;  %v2864_v13 = vld [vmem:[%s3851_s4 + $0x64] ss:$16 sps:$4 sm:$0xff] (!%p456_p3)  }
   0xb   : > { %v2866_v14 = vld [vmem:[%s3851_s4 + $0x6c] ss:$16 sps:$4 sm:$0xff] (!%p456_p3)   ;;  %v2868_v15 = vld [vmem:[%s3851_s4 + $0x60] ss:$16 sps:$4 sm:$0xff] (!%p456_p3)   ;;  %v2869_v16 = vld [vmem:[%s3851_s4 + $0x68] ss:$16 sps:$4 sm:$0xff] (!%p456_p3)  }
   0xc   : > { %v2870_v17 = vld [vmem:[%s3851_s4 + $0x84] ss:$16 sps:$4 sm:$0xff] (!%p456_p3)   ;;  %v2872_v18 = vld [vmem:[%s3851_s4 + $0x8c] ss:$16 sps:$4 sm:$0xff] (!%p456_p3)   ;;  %v2874_v19 = vld [vmem:[%s3851_s4 + $0x80] ss:$16 sps:$4 sm:$0xff] (!%p456_p3)  }
   0xd   : > { %874 = vmatpush1.bf16.msra.mxu0 (!%p456_p3), %v2856_v7  ;;  %935 = vmatpush1.bf16.msra.mxu1 (!%p456_p3), %v2857_v8  ;;  %v2875_v20 = vld [vmem:[%s3851_s4 + $0x88] ss:$16 sps:$4 sm:$0xff] (!%p456_p3)   ;;  %v2876_v21 = vld [vmem:[%s3851_s4 + $0xa4] ss:$16 sps:$4 sm:$0xff] (!%p456_p3)   ;;  %v2878_v22 = vld [vmem:[%s3851_s4 + $0xac] ss:$16 sps:$4 sm:$0xff] (!%p456_p3)  }
   0xe   : > { %875 = vmatprep.subr.bf16.mxu0 %v2858_v9  ;;  %936 = vmatprep.subr.bf16.mxu1 %v2860_v10  ;;  %s3870_s25 = smov (!%p557_p4, %s3096_s25), 1  ;;  %v2880_v23 = vld [vmem:[%s3851_s4 + $0xa0] ss:$16 sps:$4 sm:$0xff]   ;;  %v2881_v24 = vld [vmem:[%s3851_s4 + $0xa8] ss:$16 sps:$4 sm:$0xff]   ;;  %vm3108_vm7 = vmmov 0  }
   0xf   : > { %v2882_v25 = vld [vmem:[%s3851_s4 + $0xc4] ss:$16 sps:$4 sm:$0xff]   ;;  %v2884_v26 = vld [vmem:[%s3851_s4 + $0xcc] ss:$16 sps:$4 sm:$0xff]   ;;  %s3284_s29 = smul.u32 40, %s3870_s25  ;;  %s2756_s19 = sshll.u32 %s3870_s25, 4 }
  0x10   : > { %v2886_v27 = vld [vmem:[%s3851_s4 + $0xc0] ss:$16 sps:$4 sm:$0xff]   ;;  %v2887_v28 = vld [vmem:[%s3851_s4 + $0xc8] ss:$16 sps:$4 sm:$0xff]   ;;  %v2888_v29 = vld [vmem:[%s3851_s4 + $0xe4] ss:$16 sps:$4 sm:$0xff]  }
  0x11   : > { %876 = vmatpush1.bf16.msra.mxu0 %v2862_v11  ;;  %937 = vmatpush1.bf16.msra.mxu1 %v2863_v12  ;;  %v2890_v30 = vld [vmem:[%s3851_s4 + $0xec] ss:$16 sps:$4 sm:$0xff]   ;;  %s3302_s23 = scalar_lea.vmem %s3848_s1, %s3284_s29  ;;  %v2892_v31 = vld [vmem:[%s3851_s4 + $0xe0] ss:$16 sps:$4 sm:$0xff]   ;;  %v2893_v32 = vld [vmem:[%s3851_s4 + $0xe8] ss:$16 sps:$4 sm:$0xff]   ;;  %s3407_s16 = scalar_lea.vmem %s3847_s0, %s3284_s29 }
  0x12   : > { %877 = vmatprep.subr.bf16.mxu0 %v2864_v13  ;;  %938 = vmatprep.subr.bf16.mxu1 %v2866_v14  ;;  %v671_v33 = vld [vmem:[%s3302_s23] sm:$0xff]  ;;  %v672_v34 = vld [vmem:[%s3302_s23 + $0x8] sm:$0xff]  ;;  %v673_v45 = vld [vmem:[%s3302_s23 + $0x10] sm:$0xff]  ;;  %v1426_v13 = vand.u32 127, %v1419_v4  ;;  %vm1455_vm12 = vcmask 80896   ;;  %s3649_s21 = scalar_lea.vmem %s3859_s12, %s3284_s29  ;;  %s3655_s24 = scalar_lea.vmem %s3860_s13, %s3284_s29 }
  0x13   : > { %v2896_v35 = vld [vmem:[%s3850_s3 + $0x4] ss:$16 sps:$4 sm:$0xff]   ;;  %v2899_v36 = vld [vmem:[%s3850_s3 + $0xc] ss:$16 sps:$4 sm:$0xff]   ;;  %v676_v37 = vpack.c.bf16 %v672_v34, %v671_v33  ;;  %v2894_v38 = vld [vmem:[%s3850_s3] ss:$16 sps:$4 sm:$0xff]  }
  0x14   : > { %v2897_v39 = vld [vmem:[%s3850_s3 + $0x8] ss:$16 sps:$4 sm:$0xff]   ;;  %v2902_v40 = vld [vmem:[%s3850_s3 + $0x24] ss:$16 sps:$4 sm:$0xff]   ;;  %v2905_v41 = vld [vmem:[%s3850_s3 + $0x2c] ss:$16 sps:$4 sm:$0xff]  }
  0x15   : > { %878 = vmatpush1.bf16.msra.mxu0 %v2868_v15  ;;  %939 = vmatpush1.bf16.msra.mxu1 %v2869_v16  ;;  %v2900_v42 = vld [vmem:[%s3850_s3 + $0x20] ss:$16 sps:$4 sm:$0xff]   ;;  %v2903_v43 = vld [vmem:[%s3850_s3 + $0x28] ss:$16 sps:$4 sm:$0xff]   ;;  %v2908_v44 = vld [vmem:[%s3850_s3 + $0x44] ss:$16 sps:$4 sm:$0xff]  }
  0x16   : > { %879 = vmatprep.subr.bf16.mxu0 %v2870_v17  ;;  %940 = vmatprep.subr.bf16.mxu1 %v2872_v18  ;;  %v674_v46 = vld [vmem:[%s3302_s23 + $0x18] sm:$0xff]  ;;  %v2906_v48 = vld [vmem:[%s3850_s3 + $0x40] ss:$16 sps:$4 sm:$0xff]   ;;  %v2914_v51 = vld [vmem:[%s3850_s3 + $0x64] ss:$16 sps:$4 sm:$0xff]   ;;  %v3432_v18 = vshrl.u32 %v1419_v4, 7 }
  0x17   : > { %v2911_v47 = vld [vmem:[%s3850_s3 + $0x4c] ss:$16 sps:$4 sm:$0xff]   ;;  %v677_v49 = vpack.c.bf16 %v674_v46, %v673_v45  ;;  %v2909_v50 = vld [vmem:[%s3850_s3 + $0x48] ss:$16 sps:$4 sm:$0xff]   ;;  %v2912_v53 = vld [vmem:[%s3850_s3 + $0x60] ss:$16 sps:$4 sm:$0xff]  }
  0x18   : > { %v2917_v52 = vld [vmem:[%s3850_s3 + $0x6c] ss:$16 sps:$4 sm:$0xff]   ;;  %v2915_v54 = vld [vmem:[%s3850_s3 + $0x68] ss:$16 sps:$4 sm:$0xff]   ;;  %v675_v55 = vld [vmem:[%s3302_s23 + $0x20] sm:$0xff]  ;;  %s584_s23 = scalar_lea.vmem %s3849_s2, %s2756_s19  ;;  %s2818_s19 = smul.u32 80, %s3870_s25 }
  0x19   : > { %880 = vmatpush1.bf16.msra.mxu0 %v2874_v19  ;;  %941 = vmatpush1.bf16.msra.mxu1 %v2875_v20  ;;  %v2920_v56 = vld [vmem:[%s3850_s3 + $0x84] ss:$16 sps:$4 sm:$0xff]   ;;  %v2923_v57 = vld [vmem:[%s3850_s3 + $0x8c] ss:$16 sps:$4 sm:$0xff]   ;;  %v678_v58 = vpack.c.bf16 %v675_v55, %v675_v55  ;;  %v2918_v59 = vld [vmem:[%s3850_s3 + $0x80] ss:$16 sps:$4 sm:$0xff]  }
  0x1a   : > { %881 = vmatprep.subr.bf16.mxu0 %v2876_v21  ;;  %942 = vmatprep.subr.bf16.mxu1 %v2878_v22  ;;  %v2921_v60 = vld [vmem:[%s3850_s3 + $0x88] ss:$16 sps:$4 sm:$0xff]   ;;  %v2926_v61 = vld [vmem:[%s3850_s3 + $0xa4] ss:$16 sps:$4 sm:$0xff]   ;;  %v2929_v62 = vld [vmem:[%s3850_s3 + $0xac] ss:$16 sps:$4 sm:$0xff]  }
  0x1b   : > { %v2924_v63 = vld [vmem:[%s3850_s3 + $0xa0] ss:$16 sps:$4 sm:$0xff]   ;;  %v2927_v0 = vld [vmem:[%s3850_s3 + $0xa8] ss:$16 sps:$4 sm:$0xff]   ;;  %v2932_v1 = vld [vmem:[%s3850_s3 + $0xc4] ss:$16 sps:$4 sm:$0xff]  }
  0x1c   : > { %v2935_v3 = vld [vmem:[%s3850_s3 + $0xcc] ss:$16 sps:$4 sm:$0xff]   ;;  %v2930_v5 = vld [vmem:[%s3850_s3 + $0xc0] ss:$16 sps:$4 sm:$0xff]   ;;  %v2933_v6 = vld [vmem:[%s3850_s3 + $0xc8] ss:$16 sps:$4 sm:$0xff]  }
  0x1d   : > { %882 = vmatpush1.bf16.msra.mxu0 %v2880_v23  ;;  %943 = vmatpush1.bf16.msra.mxu1 %v2881_v24  ;;  %v2938_v7 = vld [vmem:[%s3850_s3 + $0xe4] ss:$16 sps:$4 sm:$0xff]   ;;  %v2941_v8 = vld [vmem:[%s3850_s3 + $0xec] ss:$16 sps:$4 sm:$0xff]   ;;  %v2936_v9 = vld [vmem:[%s3850_s3 + $0xe0] ss:$16 sps:$4 sm:$0xff]  }
  0x1e   : > { %883 = vmatprep.subr.bf16.mxu0 %v2882_v25  ;;  %944 = vmatprep.subr.bf16.mxu1 %v2884_v26  ;;  %v2939_v10 = vld [vmem:[%s3850_s3 + $0xe8] ss:$16 sps:$4 sm:$0xff]   ;;  %v631_v11 = vld [vmem:[%s3407_s16] sm:$0xff]  ;;  %v3434_v19 = vmul.u32 4, %v1426_v13  ;;  %v2947_v22 = vld [vmem:[%s3853_s6 + $0x14] ss:$8 sps:$4 sm:$0xff]  }
  0x1f   : > { %v1452_v12 = vld [vmem:[%s584_s23] sm:$0xff]  ;;  %v1453_v14 = vld [vmem:[%s584_s23 + $0x8] sm:$0x3]  ;;  %v3107_v23 = vmov 0.0   ;;  %v633_v24 = vld [vmem:[%s3407_s16 + $0x10] sm:$0xff]  ;;  %s3808_s23 = scalar_lea.vmem %s3858_s11, %s2818_s19 }
  0x20   : > { %v632_v15 = vld [vmem:[%s3407_s16 + $0x8] sm:$0xff]  ;;  %v1454_v17 = vpack.c.bf16 %v1453_v14, %v1452_v12  ;;  %v634_v25 = vld [vmem:[%s3407_s16 + $0x18] sm:$0xff]  ;;  %vm1428_vm1 = vcmp.ge.s32.totalorder %v3432_v18, %v3434_v19 }
  0x21   : > { %884 = vmatpush1.bf16.msra.mxu0 %v2886_v27  ;;  %945 = vmatpush1.bf16.msra.mxu1 %v2887_v28  ;;  %v2944_v16 = vld [vmem:[%s3853_s6 + $0x4] ss:$8 sps:$4 sm:$0xff]   ;;  %v636_v20 = vpack.c.bf16 %v632_v15, %v631_v11  ;;  %v2942_v21 = vld [vmem:[%s3853_s6] ss:$8 sps:$4 sm:$0xff]   ;;  %v1421_v27 = vadd.s32 8, %v3432_v18  ;;  %v3447_v28 = vadd.s32 4, %v3434_v19 }
  0x22   : > { %885 = vmatprep.subr.bf16.mxu0 %v2888_v29  ;;  %946 = vmatprep.subr.bf16.mxu1 %v2890_v30  ;;  %v1467_v26 = vsel %vm1465_vm0, %v1454_v17, 0  ;;  %v2945_v29 = vld [vmem:[%s3853_s6 + $0x10] ss:$8 sps:$4 sm:$0xff]   ;;  %v2950_v30 = vld [vmem:[%s3853_s6 + $0x24] ss:$8 sps:$4 sm:$0xff]  }
  0x23   : > { %vm1429_vm2 = vcmp.ge.s32.totalorder %v1421_v27, %v3434_v19  ;;  %vm1434_vm3 = vcmp.lt.s32.totalorder %v3432_v18, %v3447_v28  ;;  %vm1435_vm4 = vcmp.lt.s32.totalorder %v1421_v27, %v3447_v28  ;;  %v2953_v33 = vld [vmem:[%s3853_s6 + $0x34] ss:$8 sps:$4 sm:$0xff]   ;;  %v2957_v46 = vld [vmem:[%s3853_s6 + $0x50] ss:$8 sps:$4 sm:$0xff]   ;;  %v2968_v55 = vld [vmem:[%s3853_s6 + $0x84] ss:$8 sps:$4 sm:$0xff]  }
  0x24   : > { %vm3469_vm5 = vmand %vm1428_vm1, %vm1434_vm3  ;;  %v2978_v4 = vld [vmem:[%s3853_s6 + $0xc0] ss:$8 sps:$4 sm:$0xff]   ;;  %v2992_v11 = vld [vmem:[%s3852_s5 + $0x4] ss:$8 sps:$4 sm:$0xff]  }
  0x25   : > { %886 = vmatpush1.bf16.msra.mxu0 %v2892_v31  ;;  %947 = vmatpush1.bf16.msra.mxu1 %v2893_v32  ;;  %v637_v31 = vpack.c.bf16 %v634_v25, %v633_v24  ;;  %v2948_v32 = vld [vmem:[%s3853_s6 + $0x20] ss:$8 sps:$4 sm:$0xff]   ;;  %vm3473_vm6 = vmand %vm1429_vm2, %vm1435_vm4  ;;  %v3016_v13 = vld [vmem:[%s3855_s8 + $0x4] ss:$8 sps:$4 sm:$0xff]  }
  0x26   : > { %1153 = vmatprep.subr.bf16.mxu0 %v2896_v35  ;;  %1214 = vmatprep.subr.bf16.mxu1 %v2899_v36  ;;  %v635_v36 = vld [vmem:[%s3407_s16 + $0x20] sm:$0xff]  ;;  %v1445_v45 = vsel %vm3473_vm6, 1.0, %v3107_v23  ;;  %v3019_v14 = vld [vmem:[%s3855_s8 + $0x14] ss:$8 sps:$4 sm:$0xff]   ;;  %v3017_v15 = vld [vmem:[%s3855_s8 + $0x10] ss:$8 sps:$4 sm:$0xff]  }
  0x27   : > { %v3014_v12 = vld [vmem:[%s3855_s8] ss:$8 sps:$4 sm:$0xff]   ;;  %v3029_v24 = vld [vmem:[%s3855_s8 + $0x50] ss:$8 sps:$4 sm:$0xff]   ;;  %v3034_v25 = vld [vmem:[%s3855_s8 + $0x64] ss:$8 sps:$4 sm:$0xff]  }
  0x28   : > { %904 = vmatmul.mubr.bf16.vlgmr.msra.gmra.mrb[0].mxu0 %v676_v37  ;;  %965 = vmatmul.mubr.bf16.vlgmr.msra.gmra.mrb[0].mxu1 %v676_v37  ;;  %v2951_v37 = vld [vmem:[%s3853_s6 + $0x30] ss:$8 sps:$4 sm:$0xff]   ;;  %v3020_v17 = vld [vmem:[%s3855_s8 + $0x20] ss:$8 sps:$4 sm:$0xff]   ;;  %v3037_v27 = vld [vmem:[%s3855_s8 + $0x74] ss:$8 sps:$4 sm:$0xff]  }
  0x29   : > { %1154 = vmatpush1.bf16.msra.mxu0 %v2894_v38  ;;  %1215 = vmatpush1.bf16.msra.mxu1 %v2897_v39  ;;  %v2956_v38 = vld [vmem:[%s3853_s6 + $0x44] ss:$8 sps:$4 sm:$0xff]   ;;  %v638_v39 = vpack.c.bf16 %v635_v36, %v635_v36 }
  0x2a   : > { %1155 = vmatprep.subr.bf16.mxu0 %v2902_v40  ;;  %1216 = vmatprep.subr.bf16.mxu1 %v2905_v41  ;;  %v1422_v40 = vadd.s32 16, %v3432_v18  ;;  %v2954_v41 = vld [vmem:[%s3853_s6 + $0x40] ss:$8 sps:$4 sm:$0xff]  }
  0x2b   : > { %913 = vmatprep.mubr.bf16.mxu0 %v3106_v2  ;;  %974 = vmatprep.mubr.bf16.mxu1 %v3106_v2 }
  0x2c   : > { %vm1430_vm8 = vcmp.ge.s32.totalorder %v1422_v40, %v3434_v19  ;;  %vm1436_vm9 = vcmp.lt.s32.totalorder %v1422_v40, %v3447_v28 }
  0x2d   : > { %1156 = vmatpush1.bf16.msra.mxu0 %v2900_v42  ;;  %1217 = vmatpush1.bf16.msra.mxu1 %v2903_v43  ;;  %v1423_v42 = vadd.s32 24, %v3432_v18  ;;  %v2959_v43 = vld [vmem:[%s3853_s6 + $0x54] ss:$8 sps:$4 sm:$0xff]   ;;  %vm1441_vm13 = vmand %vm1430_vm8, %vm1436_vm9 }
  0x2e   : > { %1157 = vmatprep.subr.bf16.mxu0 %v2908_v44  ;;  %1218 = vmatprep.subr.bf16.mxu1 %v2911_v47  ;;  %v1444_v44 = vsel %vm3469_vm5, 1.0, %v3107_v23  ;;  %v2962_v47 = vld [vmem:[%s3853_s6 + $0x64] ss:$8 sps:$4 sm:$0xff]  }
  0x2f   : > { %vm1431_vm10 = vcmp.ge.s32.totalorder %v1423_v42, %v3434_v19  ;;  %vm1437_vm11 = vcmp.lt.s32.totalorder %v1423_v42, %v3447_v28 }
  0x30   : > { %914 = vmatmul.mubr.bf16.gmra.mrb[4].mxu0 %v677_v49  ;;  %975 = vmatmul.mubr.bf16.gmra.mrb[4].mxu1 %v677_v49  ;;  %vm1442_vm14 = vmand %vm1431_vm10, %vm1437_vm11  ;;  %v2960_v49 = vld [vmem:[%s3853_s6 + $0x60] ss:$8 sps:$4 sm:$0xff]  }
  0x31   : > { %1158 = vmatpush1.bf16.msra.mxu0 %v2906_v48  ;;  %1219 = vmatpush1.bf16.msra.mxu1 %v2909_v50  ;;  %v1449_v48 = vpack.c.bf16 %v1445_v45, %v1444_v44  ;;  %v1424_v50 = vadd.s32 32, %v3432_v18 }
  0x32   : > { %1159 = vmatprep.subr.bf16.mxu0 %v2914_v51  ;;  %1220 = vmatprep.subr.bf16.mxu1 %v2917_v52  ;;  %v2965_v51 = vld [vmem:[%s3853_s6 + $0x74] ss:$8 sps:$4 sm:$0xff]   ;;  %v1446_v52 = vsel %vm1441_vm13, 1.0, %v3107_v23 }
  0x33   : > { %923 = vmatprep.mubr.bf16.mxu0 %v3106_v2  ;;  %984 = vmatprep.mubr.bf16.mxu1 %v3106_v2  ;;  %vm1432_vm15 = vcmp.ge.s32.totalorder %v1424_v50, %v3434_v19  ;;  %vm1438_vm0 = vcmp.lt.s32.totalorder %v1424_v50, %v3447_v28  ;;  %v3025_v19 = vld [vmem:[%s3855_s8 + $0x34] ss:$8 sps:$4 sm:$0xff]   ;;  %v3035_v28 = vld [vmem:[%s3855_s8 + $0x70] ss:$8 sps:$4 sm:$0xff]  }
  0x34   : > { %vm1443_vm1 = vmand %vm1432_vm15, %vm1438_vm0 }
  0x35   : > { %1160 = vmatpush1.bf16.msra.mxu0 %v2912_v53  ;;  %1221 = vmatpush1.bf16.msra.mxu1 %v2915_v54  ;;  %v1447_v53 = vsel %vm1442_vm14, 1.0, %v3107_v23  ;;  %v2963_v54 = vld [vmem:[%s3853_s6 + $0x70] ss:$8 sps:$4 sm:$0xff]  }
  0x36   : > { %1161 = vmatprep.subr.bf16.mxu0 %v2920_v56  ;;  %1222 = vmatprep.subr.bf16.mxu1 %v2923_v57  ;;  %v1450_v56 = vpack.c.bf16 %v1447_v53, %v1446_v52  ;;  %v2966_v57 = vld [vmem:[%s3853_s6 + $0x80] ss:$8 sps:$4 sm:$0xff]  }
  0x38   : > { %924 = vmatmul.mubr.bf16.gmra.mrb[8].mxu0 %v678_v58  ;;  %985 = vmatmul.mubr.bf16.gmra.mrb[8].mxu1 %v678_v58  ;;  %v2971_v58 = vld [vmem:[%s3853_s6 + $0x94] ss:$8 sps:$4 sm:$0xff]  }
  0x39   : > { %1162 = vmatpush1.bf16.msra.mxu0 %v2918_v59  ;;  %1223 = vmatpush1.bf16.msra.mxu1 %v2921_v60  ;;  %v1448_v59 = vsel %vm1443_vm1, 1.0, %v3107_v23  ;;  %v2969_v60 = vld [vmem:[%s3853_s6 + $0x90] ss:$8 sps:$4 sm:$0xff]  }
  0x3a   : > { %1163 = vmatprep.subr.bf16.mxu0 %v2926_v61  ;;  %1224 = vmatprep.subr.bf16.mxu1 %v2929_v62  ;;  %v1451_v61 = vpack.c.bf16 %v1448_v59, %v1448_v59  ;;  %v2974_v62 = vld [vmem:[%s3853_s6 + $0xa4] ss:$8 sps:$4 sm:$0xff]  }
  0x3b   : > { %1185 = vmatprep.mubr.bf16.mxu0 %v3106_v2  ;;  %1246 = vmatprep.mubr.bf16.mxu1 %v3106_v2 }
  0x3d   : > { %1164 = vmatpush1.bf16.msra.mxu0 %v2924_v63  ;;  %1225 = vmatpush1.bf16.msra.mxu1 %v2927_v0  ;;  %v2972_v63 = vld [vmem:[%s3853_s6 + $0xa0] ss:$8 sps:$4 sm:$0xff]   ;;  %v2977_v0 = vld [vmem:[%s3853_s6 + $0xb4] ss:$8 sps:$4 sm:$0xff]  }
  0x3e   : > { %1165 = vmatprep.subr.bf16.mxu0 %v2932_v1  ;;  %1226 = vmatprep.subr.bf16.mxu1 %v2935_v3  ;;  %v2975_v1 = vld [vmem:[%s3853_s6 + $0xb0] ss:$8 sps:$4 sm:$0xff]   ;;  %v2980_v3 = vld [vmem:[%s3853_s6 + $0xc4] ss:$8 sps:$4 sm:$0xff]  }
  0x41   : > { %1166 = vmatpush1.bf16.msra.mxu0 %v2930_v5  ;;  %1227 = vmatpush1.bf16.msra.mxu1 %v2933_v6  ;;  %v2983_v5 = vld [vmem:[%s3853_s6 + $0xd4] ss:$8 sps:$4 sm:$0xff]   ;;  %v2981_v6 = vld [vmem:[%s3853_s6 + $0xd0] ss:$8 sps:$4 sm:$0xff]  }
  0x42   : > { %1167 = vmatprep.subr.bf16.mxu0 %v2938_v7  ;;  %1228 = vmatprep.subr.bf16.mxu1 %v2941_v8  ;;  %v2986_v7 = vld [vmem:[%s3853_s6 + $0xe4] ss:$8 sps:$4 sm:$0xff]   ;;  %v2984_v8 = vld [vmem:[%s3853_s6 + $0xe0] ss:$8 sps:$4 sm:$0xff]  }
  0x45   : > { %1168 = vmatpush1.bf16.msra.mxu0 %v2936_v9  ;;  %1229 = vmatpush1.bf16.msra.mxu1 %v2939_v10  ;;  %v2989_v9 = vld [vmem:[%s3853_s6 + $0xf4] ss:$8 sps:$4 sm:$0xff]   ;;  %v2987_v10 = vld [vmem:[%s3853_s6 + $0xf0] ss:$8 sps:$4 sm:$0xff]  }
  0x46   : > { %2771 = vmatprep.subr.bf16.mxu0 %v3107_v23  ;;  %1742 = vmatprep.subr.bf16.mxu1 %v2944_v16  ;;  %v3022_v16 = vld [vmem:[%s3855_s8 + $0x24] ss:$8 sps:$4 sm:$0xff]  }
  0x48   : > { %1186 = vmatmul.mubr.bf16.vlgmr.msra.gmra.mrb[0].mxu0 %v636_v20  ;;  %1247 = vmatmul.mubr.bf16.vlgmr.msra.gmra.mrb[0].mxu1 %v636_v20  ;;  %v3023_v20 = vld [vmem:[%s3855_s8 + $0x30] ss:$8 sps:$4 sm:$0xff]  }
  0x49   : > { %1195 = vmatprep.mubr.bf16.mxu0 %v3106_v2  ;;  %1256 = vmatprep.mubr.bf16.mxu1 %v3106_v2 }
  0x4a   : > { %2772 = vmatpush3.bf16.msra.mxu0 %v1467_v26  ;;  %1743 = vmatpush1.bf16.msra.mxu1 %v2942_v21  ;;  %v3028_v21 = vld [vmem:[%s3855_s8 + $0x44] ss:$8 sps:$4 sm:$0xff]   ;;  %v3032_v26 = vld [vmem:[%s3855_s8 + $0x60] ss:$8 sps:$4 sm:$0xff]  }
  0x4b   : > { %1744 = vmatprep.subr.bf16.mxu1 %v2947_v22  ;;  %2186 = vmatprep.subr.bf16.mxu0 %v3016_v13  ;;  %v3026_v22 = vld [vmem:[%s3855_s8 + $0x40] ss:$8 sps:$4 sm:$0xff]  }
  0x4e   : > { %1745 = vmatpush1.bf16.msra.mxu1 %v2945_v29  ;;  %v3040_v29 = vld [vmem:[%s3855_s8 + $0x84] ss:$8 sps:$4 sm:$0xff]  }
  0x4f   : > { %1746 = vmatprep.subr.bf16.mxu1 %v2950_v30  ;;  %v3038_v30 = vld [vmem:[%s3855_s8 + $0x80] ss:$8 sps:$4 sm:$0xff]  }
  0x50   : > { %1196 = vmatmul.mubr.bf16.gmra.mrb[4].mxu0 %v637_v31  ;;  %1257 = vmatmul.mubr.bf16.gmra.mrb[4].mxu1 %v637_v31  ;;  %v3043_v31 = vld [vmem:[%s3855_s8 + $0x94] ss:$8 sps:$4 sm:$0xff]  }
  0x51   : > { %1205 = vmatprep.mubr.bf16.mxu0 %v3106_v2  ;;  %1266 = vmatprep.mubr.bf16.mxu1 %v3106_v2 }
  0x52   : > { %1747 = vmatpush1.bf16.msra.mxu1 %v2948_v32  ;;  %v3041_v32 = vld [vmem:[%s3855_s8 + $0x90] ss:$8 sps:$4 sm:$0xff]  }
  0x53   : > { %1748 = vmatprep.subr.bf16.mxu1 %v2953_v33 }
  0x56   : > { %1749 = vmatpush1.bf16.msra.mxu1 %v2951_v37 }
  0x57   : > { %1750 = vmatprep.subr.bf16.mxu1 %v2956_v38 }
  0x58   : > { %1206 = vmatmul.mubr.bf16.gmra.mrb[8].mxu0 %v638_v39  ;;  %1267 = vmatmul.mubr.bf16.gmra.mrb[8].mxu1 %v638_v39 }
  0x59   : > { %2773 = vmatprep.mubr.msk.bf16.mxu0 %vm3108_vm7, %v3107_v23 }
  0x5a   : > { %1751 = vmatpush1.bf16.msra.mxu1 %v2954_v41 }
  0x5b   : > { %1752 = vmatprep.subr.bf16.mxu1 %v2959_v43 }
  0x5e   : > { %1753 = vmatpush1.bf16.msra.mxu1 %v2957_v46 }
  0x5f   : > { %1754 = vmatprep.subr.bf16.mxu1 %v2962_v47 }
  0x60   : > { %2774 = vmatmul.mubr.msk.bf16.vlgmr.msra.gmra.mrb[12].mxu0 %vm1455_vm12, %v1449_v48 }
  0x61   : > { %2777 = vmatprep.mubr.msk.bf16.mxu0 %vm3108_vm7, %v3107_v23  ;;  %2187 = vmatpush1.bf16.msra.mxu0 %v3014_v12 }
  0x62   : > { %1755 = vmatpush1.bf16.msra.mxu1 %v2960_v49  ;;  %2188 = vmatprep.subr.bf16.mxu0 %v3019_v14 }
  0x63   : > { %1756 = vmatprep.subr.bf16.mxu1 %v2965_v51 }
  0x65   : > { %2189 = vmatpush1.bf16.msra.mxu0 %v3017_v15 }
  0x66   : > { %1757 = vmatpush1.bf16.msra.mxu1 %v2963_v54  ;;  %2190 = vmatprep.subr.bf16.mxu0 %v3022_v16 }
  0x67   : > { %1758 = vmatprep.subr.bf16.mxu1 %v2968_v55 }
  0x68   : > { %2778 = vmatmul.mubr.msk.bf16.gmra.mrb[16].mxu0 %vm1455_vm12, %v1450_v56 }
  0x69   : > { %2781 = vmatprep.mubr.msk.bf16.mxu0 %vm3108_vm7, %v3107_v23  ;;  %2191 = vmatpush1.bf16.msra.mxu0 %v3020_v17  ;;  %v3031_v23 = vld [vmem:[%s3855_s8 + $0x54] ss:$8 sps:$4 sm:$0xff]  }
  0x6a   : > { %1759 = vmatpush1.bf16.msra.mxu1 %v2966_v57  ;;  %2192 = vmatprep.subr.bf16.mxu0 %v3025_v19 }
  0x6b   : > { %1760 = vmatprep.subr.bf16.mxu1 %v2971_v58 }
  0x6d   : > { %2193 = vmatpush1.bf16.msra.mxu0 %v3023_v20 }
  0x6e   : > { %1761 = vmatpush1.bf16.msra.mxu1 %v2969_v60  ;;  %2194 = vmatprep.subr.bf16.mxu0 %v3028_v21 }
  0x6f   : > { %1762 = vmatprep.subr.bf16.mxu1 %v2974_v62 }
  0x70   : > { %2782 = vmatmul.mubr.msk.bf16.gmra.mrb[20].mxu0 %vm1455_vm12, %v1451_v61 }
  0x71   : > { %2195 = vmatpush1.bf16.msra.mxu0 %v3026_v22 }
  0x72   : > { %1763 = vmatpush1.bf16.msra.mxu1 %v2972_v63  ;;  %2196 = vmatprep.subr.bf16.mxu0 %v3031_v23 }
  0x73   : > { %1764 = vmatprep.subr.bf16.mxu1 %v2977_v0 }
  0x75   : > { %2197 = vmatpush1.bf16.msra.mxu0 %v3029_v24 }
  0x76   : > { %1765 = vmatpush1.bf16.msra.mxu1 %v2975_v1  ;;  %2198 = vmatprep.subr.bf16.mxu0 %v3034_v25 }
  0x77   : > { %1766 = vmatprep.subr.bf16.mxu1 %v2980_v3 }
  0x79   : > { %2199 = vmatpush1.bf16.msra.mxu0 %v3032_v26 }
  0x7a   : > { %1767 = vmatpush1.bf16.msra.mxu1 %v2978_v4  ;;  %2200 = vmatprep.subr.bf16.mxu0 %v3037_v27 }
  0x7b   : > { %1768 = vmatprep.subr.bf16.mxu1 %v2983_v5 }
  0x7d   : > { %2201 = vmatpush1.bf16.msra.mxu0 %v3035_v28 }
  0x7e   : > { %1769 = vmatpush1.bf16.msra.mxu1 %v2981_v6  ;;  %2202 = vmatprep.subr.bf16.mxu0 %v3040_v29 }
  0x7f   : > { %1770 = vmatprep.subr.bf16.mxu1 %v2986_v7 }
  0x81   : > { %2203 = vmatpush1.bf16.msra.mxu0 %v3038_v30 }
  0x82   : > { %1771 = vmatpush1.bf16.msra.mxu1 %v2984_v8  ;;  %2204 = vmatprep.subr.bf16.mxu0 %v3043_v31 }
  0x83   : > { %1772 = vmatprep.subr.bf16.mxu1 %v2989_v9 }
  0x85   : > { %2205 = vmatpush1.bf16.msra.mxu0 %v3041_v32 }
  0x86   : > { %1773 = vmatpush1.bf16.msra.mxu1 %v2987_v10 }
  0x87   : > { %1883 = vmatprep.subr.bf16.mxu1 %v2992_v11 }
 0x11b   : > { %v1187_v33 = vpop.f32.mrb[0].mxu0  ;;  %v1248_v34 = vpop.f32.mrb[0].mxu1 }
 0x11c   : > { %v1275_v35 = vmul.f32 %v1187_v33, %v1187_v33  ;;  %v1285_v36 = vmul.f32 %v1248_v34, %v1248_v34  ;;  %v1189_v37 = vpop.f32.mrb[1].mxu0  ;;  %v1250_v38 = vpop.f32.mrb[1].mxu1 }
 0x11d   : > { %v1276_v39 = vmul.f32 %v1189_v37, %v1189_v37  ;;  %v2757_v40 = vpack.c.bf16 %v1189_v37, %v1187_v33  ;;  %v1286_v41 = vmul.f32 %v1250_v38, %v1250_v38  ;;  %v2762_v42 = vpack.c.bf16 %v1250_v38, %v1248_v34  ;;  %v1191_v43 = vpop.f32.mrb[2].mxu0  ;;  %v1252_v44 = vpop.f32.mrb[2].mxu1 }
 0x11e   : > { %v1295_v45 = vadd.f32 %v1285_v36, %v1275_v35  ;;  %v1277_v46 = vmul.f32 %v1191_v43, %v1191_v43  ;;  %v1287_v47 = vmul.f32 %v1252_v44, %v1252_v44  ;;  %v1193_v48 = vpop.f32.mrb[3].mxu0  ;;  %v1254_v49 = vpop.f32.mrb[3].mxu1 }
 0x11f   : > { %1377 = vst [vmem:[%s3649_s21] sm:$0xff] %v2757_v40  ;;  %v1296_v50 = vadd.f32 %v1286_v41, %v1276_v39  ;;  %1414 = vst [vmem:[%s3655_s24] sm:$0xff] %v2762_v42  ;;  %v1278_v51 = vmul.f32 %v1193_v48, %v1193_v48  ;;  %v2758_v52 = vpack.c.bf16 %v1193_v48, %v1191_v43 }
 0x120   : > { %v1288_v53 = vmul.f32 %v1254_v49, %v1254_v49  ;;  %v1305_v54 = vadd.f32 1e-12, %v1295_v45  ;;  %v1297_v55 = vadd.f32 %v1287_v47, %v1277_v46  ;;  %v2763_v56 = vpack.c.bf16 %v1254_v49, %v1252_v44 }
 0x121   : > { %v1306_v57 = vadd.f32 1e-12, %v1296_v50  ;;  %1378 = vst [vmem:[%s3649_s21 + $0x8] sm:$0xff] %v2758_v52 }
 0x122   : > { %v1298_v58 = vadd.f32 %v1288_v53, %v1278_v51  ;;  %3062 = vlog2.f32 %v1305_v54  ;;  %v1307_v59 = vadd.f32 1e-12, %v1297_v55  ;;  %1415 = vst [vmem:[%s3655_s24 + $0x8] sm:$0xff] %v2763_v56 }
 0x123   : > { %3064 = vlog2.f32 %v1306_v57  ;;  %v1197_v61 = vpop.f32.mrb[4].mxu0  ;;  %v1258_v62 = vpop.f32.mrb[4].mxu1 }
 0x124   : > { %v1308_v60 = vadd.f32 1e-12, %v1298_v58  ;;  %3066 = vlog2.f32 %v1307_v59  ;;  %v1279_v63 = vmul.f32 %v1197_v61, %v1197_v61  ;;  %v1289_v0 = vmul.f32 %v1258_v62, %v1258_v62  ;;  %v1199_v1 = vpop.f32.mrb[5].mxu0  ;;  %v1260_v3 = vpop.f32.mrb[5].mxu1 }
 0x125   : > { %v1280_v4 = vmul.f32 %v1199_v1, %v1199_v1  ;;  %v2759_v5 = vpack.c.bf16 %v1199_v1, %v1197_v61  ;;  %v1290_v6 = vmul.f32 %v1260_v3, %v1260_v3  ;;  %v1201_v7 = vpop.f32.mrb[6].mxu0  ;;  %v1262_v8 = vpop.f32.mrb[6].mxu1  ;;  %v2764_v10 = vpack.c.bf16 %v1260_v3, %v1258_v62 }
 0x126   : > { %3068 = vlog2.f32 %v1308_v60  ;;  %v1299_v9 = vadd.f32 %v1289_v0, %v1279_v63  ;;  %v1281_v11 = vmul.f32 %v1201_v7, %v1201_v7  ;;  %v1291_v12 = vmul.f32 %v1262_v8, %v1262_v8  ;;  %v1203_v13 = vpop.f32.mrb[7].mxu0  ;;  %v1264_v14 = vpop.f32.mrb[7].mxu1  ;;  %v2990_v60 = vld [vmem:[%s3852_s5] ss:$8 sps:$4 sm:$0xff]   ;;  %v2995_v0 = vld [vmem:[%s3852_s5 + $0x14] ss:$8 sps:$4 sm:$0xff]  }
 0x127   : > { %1379 = vst [vmem:[%s3649_s21 + $0x10] sm:$0xff] %v2759_v5  ;;  %v1300_v15 = vadd.f32 %v1290_v6, %v1280_v4  ;;  %v1282_v16 = vmul.f32 %v1203_v13, %v1203_v13  ;;  %v2760_v17 = vpack.c.bf16 %v1203_v13, %v1201_v7  ;;  %v1292_v19 = vmul.f32 %v1264_v14, %v1264_v14 }
 0x128   : > { %v1309_v20 = vadd.f32 1e-12, %v1299_v9  ;;  %1416 = vst [vmem:[%s3655_s24 + $0x10] sm:$0xff] %v2764_v10  ;;  %v1301_v21 = vadd.f32 %v1291_v12, %v1281_v11  ;;  %v2765_v22 = vpack.c.bf16 %v1264_v14, %v1262_v8  ;;  %v2993_v10 = vld [vmem:[%s3852_s5 + $0x10] ss:$8 sps:$4 sm:$0xff]  }
 0x129   : > { %v1310_v23 = vadd.f32 1e-12, %v1300_v15  ;;  %1380 = vst [vmem:[%s3649_s21 + $0x18] sm:$0xff] %v2760_v17  ;;  %v1302_v24 = vadd.f32 %v1292_v19, %v1282_v16  ;;  %v2998_v12 = vld [vmem:[%s3852_s5 + $0x24] ss:$8 sps:$4 sm:$0xff]  }
 0x12a   : > { %3070 = vlog2.f32 %v1309_v20  ;;  %v1311_v25 = vadd.f32 1e-12, %v1301_v21  ;;  %1417 = vst [vmem:[%s3655_s24 + $0x18] sm:$0xff] %v2765_v22  ;;  %v2996_v21 = vld [vmem:[%s3852_s5 + $0x20] ss:$8 sps:$4 sm:$0xff]  }
 0x12b   : > { %3072 = vlog2.f32 %v1310_v23  ;;  %v1312_v26 = vadd.f32 1e-12, %v1302_v24  ;;  %v1207_v27 = vpop.f32.mrb[8].mxu0  ;;  %v1268_v28 = vpop.f32.mrb[8].mxu1  ;;  %v3001_v24 = vld [vmem:[%s3852_s5 + $0x34] ss:$8 sps:$4 sm:$0xff]  }
 0x12c   : > { %v3063_v29 = vpop.eup %3062  ;;  %3074 = vlog2.f32 %v1311_v25  ;;  %v1283_v30 = vmul.f32 %v1207_v27, %v1207_v27  ;;  %v1293_v31 = vmul.f32 %v1268_v28, %v1268_v28  ;;  %v1209_v32 = vpop.f32.mrb[9].mxu0 }
 0x12d   : > { %v1270_v33 = vpop.f32.mrb[9].mxu1  ;;  %v3065_v34 = vpop.eup %3064  ;;  %3076 = vlog2.f32 %v1312_v26  ;;  %v1284_v35 = vmul.f32 %v1209_v32, %v1209_v32  ;;  %v2761_v36 = vpack.c.bf16 %v1209_v32, %v1207_v27  ;;  %v1316_v47 = vmul.f32 0.6931472, %v3063_v29 }
 0x12e   : > { %v1211_v37 = vpop.f32.mrb[10].mxu0  ;;  %v1272_v38 = vpop.f32.mrb[10].mxu1  ;;  %v1303_v40 = vadd.f32 %v1293_v31, %v1283_v30  ;;  %v1294_v41 = vmul.f32 %v1270_v33, %v1270_v33  ;;  %v2766_v42 = vpack.c.bf16 %v1270_v33, %v1268_v28  ;;  %v1318_v45 = vmul.f32 0.6931472, %v3065_v34  ;;  %v2999_v31 = vld [vmem:[%s3852_s5 + $0x30] ss:$8 sps:$4 sm:$0xff]  }
 0x12f   : > { %v3067_v39 = vpop.eup %3066  ;;  %v1212_v43 = vpop.f32.mrb[11].mxu0  ;;  %1381 = vst [vmem:[%s3649_s21 + $0x20] sm:$0xff] %v2761_v36  ;;  %v3673_v56 = vmul.f32 0.5, %v1316_v47  ;;  %v3004_v33 = vld [vmem:[%s3852_s5 + $0x44] ss:$8 sps:$4 sm:$0xff]   ;;  %s3801_s21 = scalar_lea.vmem %s3857_s10, %s2818_s19 }
 0x130   : > { %v1273_v44 = vpop.f32.mrb[11].mxu1  ;;  %v3069_v46 = vpop.eup %3068  ;;  %v1320_v48 = vmul.f32 0.6931472, %v3067_v39  ;;  %v1313_v49 = vadd.f32 1e-12, %v1303_v40  ;;  %v1304_v50 = vadd.f32 %v1294_v41, %v1284_v35  ;;  %1418 = vst [vmem:[%s3655_s24 + $0x20] sm:$0xff] %v2766_v42 }
 0x131   : > { %v1322_v51 = vmul.f32 0.6931472, %v3069_v46  ;;  %v3669_v54 = vmul.f32 0.5, %v1318_v45  ;;  %v3002_v37 = vld [vmem:[%s3852_s5 + $0x40] ss:$8 sps:$4 sm:$0xff]  }
 0x132   : > { %v3667_v52 = vmul.f32 0.5, %v1320_v48  ;;  %3078 = vlog2.f32 %v1313_v49  ;;  %v1314_v53 = vadd.f32 1e-12, %v1304_v50  ;;  %v3007_v40 = vld [vmem:[%s3852_s5 + $0x54] ss:$8 sps:$4 sm:$0xff]  }
 0x133   : > { %v3671_v55 = vmul.f32 0.5, %v1322_v51  ;;  %v3675_v57 = vpop.f32.mrb[12].mxu0  ;;  %v3005_v43 = vld [vmem:[%s3852_s5 + $0x50] ss:$8 sps:$4 sm:$0xff]   ;;  %v3010_v44 = vld [vmem:[%s3852_s5 + $0x64] ss:$8 sps:$4 sm:$0xff]  }
 0x134   : > { %v3071_v58 = vpop.eup %3070  ;;  %3080 = vlog2.f32 %v1314_v53  ;;  %v2775_v61 = vpop.f32.mrb[13].mxu0  ;;  %v1544_v63 = vpack.c.bf16 %v3667_v52, %v3673_v56  ;;  %v3008_v45 = vld [vmem:[%s3852_s5 + $0x60] ss:$8 sps:$4 sm:$0xff]   ;;  %v3013_v46 = vld [vmem:[%s3852_s5 + $0x74] ss:$8 sps:$4 sm:$0xff]  }
 0x135   : > { %v1545_v59 = vpack.c.bf16 %v3671_v55, %v3669_v54  ;;  %v3073_v62 = vpop.eup %3072  ;;  %v3687_v1 = vpop.f32.mrb[14].mxu0  ;;  %v1324_v8 = vmul.f32 0.6931472, %v3071_v58  ;;  %v3011_v47 = vld [vmem:[%s3852_s5 + $0x70] ss:$8 sps:$4 sm:$0xff]  }
 0x136   : > { %v3075_v3 = vpop.eup %3074  ;;  %v1326_v4 = vmul.f32 0.6931472, %v3073_v62  ;;  %v1525_v5 = vpack.c.bf16 %v3687_v1, %v3675_v57  ;;  %v2776_v6 = vpop.f32.mrb[15].mxu0  ;;  %v3046_v49 = vld [vmem:[%s3855_s8 + $0xa4] ss:$8 sps:$4 sm:$0xff]  }
 0x137   : > { %1774 = vmatprep.mubr.bf16.mxu1 %v1545_v59  ;;  %v3077_v7 = vpop.eup %3076  ;;  %v1328_v9 = vmul.f32 0.6931472, %v3075_v3  ;;  %v3703_v16 = vmul.f32 0.5, %v1324_v8  ;;  %v3044_v50 = vld [vmem:[%s3855_s8 + $0xa0] ss:$8 sps:$4 sm:$0xff]   ;;  %2206 = vmatprep.subr.bf16.mxu0 %v3046_v49 }
 0x138   : > { %1775 = vmatmul.mubr.bf16.vlgmr.msra.gmra.mrb[12].mxu1 %v1544_v63  ;;  %v1330_v11 = vmul.f32 0.6931472, %v3077_v7  ;;  %v3699_v14 = vmul.f32 0.5, %v1326_v4  ;;  %v3049_v51 = vld [vmem:[%s3855_s8 + $0xb4] ss:$8 sps:$4 sm:$0xff]   ;;  %2207 = vmatpush1.bf16.msra.mxu0 %v3044_v50  ;;  %v1952_v7 = vsub.s32 1, %v3432_v18 }
 0x139   : > { %1884 = vmatpush1.bf16.msra.mxu1 %v2990_v60  ;;  %v3697_v13 = vmul.f32 0.5, %v1328_v9  ;;  %2208 = vmatprep.subr.bf16.mxu0 %v3049_v51  ;;  %v3052_v53 = vld [vmem:[%s3855_s8 + $0xc4] ss:$8 sps:$4 sm:$0xff]   ;;  %v3050_v57 = vld [vmem:[%s3855_s8 + $0xc0] ss:$8 sps:$4 sm:$0xff]  }
 0x13a   : > { %1885 = vmatprep.subr.bf16.mxu1 %v2995_v0  ;;  %v3701_v15 = vmul.f32 0.5, %v1330_v11  ;;  %v3055_v58 = vld [vmem:[%s3855_s8 + $0xd4] ss:$8 sps:$4 sm:$0xff]   ;;  %v3053_v59 = vld [vmem:[%s3855_s8 + $0xd0] ss:$8 sps:$4 sm:$0xff]  }
 0x13b   : > { %v1511_v17 = vpop.f32.mrb[16].mxu0  ;;  %v1546_v23 = vpack.c.bf16 %v3697_v13, %v3703_v16  ;;  %v3058_v60 = vld [vmem:[%s3855_s8 + $0xe4] ss:$8 sps:$4 sm:$0xff]   ;;  %v3056_v61 = vld [vmem:[%s3855_s8 + $0xe0] ss:$8 sps:$4 sm:$0xff]  }
 0x13c   : > { %v3079_v19 = vpop.eup %3078  ;;  %v1547_v20 = vpack.c.bf16 %v3701_v15, %v3699_v14  ;;  %v2779_v22 = vpop.f32.mrb[17].mxu0  ;;  %v3061_v62 = vld [vmem:[%s3855_s8 + $0xf4] ss:$8 sps:$4 sm:$0xff]   ;;  %v3059_v63 = vld [vmem:[%s3855_s8 + $0xf0] ss:$8 sps:$4 sm:$0xff]  }
 0x13d   : > { %1886 = vmatpush1.bf16.msra.mxu1 %v2993_v10  ;;  %v1332_v25 = vmul.f32 0.6931472, %v3079_v19  ;;  %v1514_v26 = vpop.f32.mrb[18].mxu0  ;;  %v1944_v6 = vld [vmem:[%s3854_s7] sm:$0x3] }
 0x13e   : > { %1887 = vmatprep.subr.bf16.mxu1 %v2998_v12  ;;  %v3081_v27 = vpop.eup %3080  ;;  %1784 = vmatprep.mubr.bf16.mxu1 %v1547_v20  ;;  %v1526_v28 = vpack.c.bf16 %v1514_v26, %v1511_v17  ;;  %v2780_v29 = vpop.f32.mrb[19].mxu0  ;;  %v1953_v9 = vrot.slane %v1944_v6, %v1952_v7 }
 0x13f   : > { %v1334_v30 = vmul.f32 0.6931472, %v3081_v27  ;;  %v3723_v34 = vmul.f32 0.5, %v1332_v25 }
 0x140   : > { %1785 = vmatmul.mubr.bf16.gmra.mrb[16].mxu1 %v1546_v23 }
 0x141   : > { %1888 = vmatpush1.bf16.msra.mxu1 %v2996_v21  ;;  %v3718_v32 = vmul.f32 0.5, %v1334_v30  ;;  %v1548_v39 = vpack.c.bf16 %v3723_v34, %v3723_v34 }
 0x142   : > { %1889 = vmatprep.subr.bf16.mxu1 %v3001_v24 }
 0x143   : > { %v1549_v35 = vpack.c.bf16 %v3718_v32, %v3718_v32  ;;  %v1519_v36 = vpop.f32.mrb[20].mxu0 }
 0x144   : > { %v2783_v38 = vpop.f32.mrb[21].mxu0  ;;  %v1527_v48 = vpack.c.bf16 %v1519_v36, %v1519_v36 }
 0x145   : > { %1890 = vmatpush1.bf16.msra.mxu1 %v2999_v31  ;;  %1794 = vmatprep.mubr.bf16.mxu1 %v1549_v35  ;;  %v1522_v41 = vpop.f32.mrb[22].mxu0 }
 0x146   : > { %1891 = vmatprep.subr.bf16.mxu1 %v3004_v33  ;;  %v2784_v42 = vpop.f32.mrb[23].mxu0 }
 0x148   : > { %1795 = vmatmul.mubr.bf16.gmra.mrb[20].mxu1 %v1548_v39 }
 0x149   : > { %1892 = vmatpush1.bf16.msra.mxu1 %v3002_v37  ;;  %1915 = vmatprep.mubr.bf16.mxu1 %v3106_v2 }
 0x14a   : > { %1893 = vmatprep.subr.bf16.mxu1 %v3007_v40 }
 0x14d   : > { %1894 = vmatpush1.bf16.msra.mxu1 %v3005_v43 }
 0x14e   : > { %1895 = vmatprep.subr.bf16.mxu1 %v3010_v44 }
 0x151   : > { %1896 = vmatpush1.bf16.msra.mxu1 %v3008_v45 }
 0x152   : > { %1897 = vmatprep.subr.bf16.mxu1 %v3013_v46 }
 0x155   : > { %1898 = vmatpush1.bf16.msra.mxu1 %v3011_v47 }
 0x158   : > { %1916 = vmatmul.mubr.bf16.vlgmr.msra.gmra.mrb[12].mxu1 %v1525_v5  ;;  %v1948_v5 = vsub.s32 0, %v3432_v18 }
 0x159   : > { %1925 = vmatprep.mubr.bf16.mxu1 %v3106_v2 }
 0x15a   : > { %v1949_v8 = vrot.slane %v1944_v6, %v1948_v5 }
 0x160   : > { %1926 = vmatmul.mubr.bf16.gmra.mrb[16].mxu1 %v1526_v28 }
 0x161   : > { %1935 = vmatprep.mubr.bf16.mxu1 %v3106_v2  ;;  %v3047_v2 = vld [vmem:[%s3855_s8 + $0xb0] ss:$8 sps:$4 sm:$0xff]  }
 0x162   : > { %2209 = vmatpush1.bf16.msra.mxu0 %v3047_v2 }
 0x163   : > { %2210 = vmatprep.subr.bf16.mxu0 %v3052_v53 }
 0x166   : > { %2211 = vmatpush1.bf16.msra.mxu0 %v3050_v57 }
 0x167   : > { %2212 = vmatprep.subr.bf16.mxu0 %v3055_v58 }
 0x168   : > { %1936 = vmatmul.mubr.bf16.gmra.mrb[24].mxu1 %v1527_v48 }
 0x16a   : > { %2213 = vmatpush1.bf16.msra.mxu0 %v3053_v59  ;;  %v2014_v59 = vld [vmem:[%s3856_s9] sm:$0x3] }
 0x16b   : > { %2214 = vmatprep.subr.bf16.mxu0 %v3058_v60  ;;  %v2019_v60 = vrot.slane %v2014_v59, %v1948_v5 }
 0x16e   : > { %2215 = vmatpush1.bf16.msra.mxu0 %v3056_v61  ;;  %v2023_v61 = vrot.slane %v2014_v59, %v1952_v7 }
 0x16f   : > { %2216 = vmatprep.subr.bf16.mxu0 %v3061_v62 }
 0x172   : > { %2217 = vmatpush1.bf16.msra.mxu0 %v3059_v63 }
 0x21b   : > { %v1796_v0 = vpop.f32.mrb[20].mxu1 }
 0x21c   : > { %v1798_v1 = vpop.f32.mrb[21].mxu1 }
 0x21d   : > { %v1800_v3 = vpop.f32.mrb[22].mxu1 }
 0x21e   : > { %v1801_v4 = vpop.f32.mrb[23].mxu1 }
 0x22b   : > { %v1917_v10 = vpop.f32.mrb[12].mxu1 }
 0x22c   : > { %v1956_v11 = vadd.f32 %v1949_v8, %v1917_v10  ;;  %v1919_v12 = vpop.f32.mrb[13].mxu1 }
 0x22d   : > { %v1957_v17 = vadd.f32 %v1953_v9, %v1919_v12  ;;  %v1921_v19 = vpop.f32.mrb[14].mxu1 }
 0x22e   : > { %v1958_v20 = vadd.f32 %v1949_v8, %v1921_v19  ;;  %v1923_v21 = vpop.f32.mrb[15].mxu1  ;;  %v1966_v23 = vmax.f32 %v1956_v11, 0.0 }
 0x22f   : > { %v1959_v22 = vadd.f32 %v1953_v9, %v1923_v21  ;;  %v1967_v25 = vmax.f32 %v1957_v17, 0.0 }
 0x230   : > { %v1968_v24 = vmax.f32 %v1958_v20, 0.0 }
 0x231   : > { %v1969_v26 = vmax.f32 %v1959_v22, 0.0 }
 0x232   : > { %v1976_v27 = vpack.c.bf16 %v1968_v24, %v1966_v23 }
 0x233   : > { %v1977_v28 = vpack.c.bf16 %v1969_v26, %v1967_v25  ;;  %v1927_v29 = vpop.f32.mrb[16].mxu1 }
 0x234   : > { %v1960_v30 = vadd.f32 %v1949_v8, %v1927_v29  ;;  %v1929_v31 = vpop.f32.mrb[17].mxu1 }
 0x235   : > { %v1961_v18 = vadd.f32 %v1953_v9, %v1929_v31  ;;  %v1931_v33 = vpop.f32.mrb[18].mxu1  ;;  %2218 = vmatprep.mubr.bf16.mxu0 %v1977_v28 }
 0x236   : > { %v1962_v35 = vadd.f32 %v1949_v8, %v1931_v33  ;;  %v1933_v36 = vpop.f32.mrb[19].mxu1  ;;  %2219 = vmatmul.mubr.bf16.vlgmr.msra.gmra.mrb[24].mxu0 %v1976_v27  ;;  %v1970_v38 = vmax.f32 %v1960_v30, 0.0 }
 0x237   : > { %v1963_v37 = vadd.f32 %v1953_v9, %v1933_v36  ;;  %v1971_v40 = vmax.f32 %v1961_v18, 0.0 }
 0x238   : > { %v1972_v39 = vmax.f32 %v1962_v35, 0.0 }
 0x239   : > { %v1973_v41 = vmax.f32 %v1963_v37, 0.0 }
 0x23a   : > { %v1978_v42 = vpack.c.bf16 %v1972_v39, %v1970_v38 }
 0x23b   : > { %v1979_v43 = vpack.c.bf16 %v1973_v41, %v1971_v40  ;;  %v1937_v44 = vpop.f32.mrb[24].mxu1 }
 0x23c   : > { %v1938_v45 = vadd.f32 %v1937_v44, %v1796_v0  ;;  %v1939_v46 = vpop.f32.mrb[25].mxu1 }
 0x23d   : > { %v1940_v47 = vadd.f32 %v1939_v46, %v1798_v1  ;;  %v1941_v48 = vpop.f32.mrb[26].mxu1  ;;  %2228 = vmatprep.mubr.bf16.mxu0 %v1979_v43 }
 0x23e   : > { %v1964_v49 = vadd.f32 %v1949_v8, %v1938_v45  ;;  %v1942_v50 = vpop.f32.mrb[27].mxu1  ;;  %2229 = vmatmul.mubr.bf16.gmra.mrb[28].mxu0 %v1978_v42 }
 0x23f   : > { %v1965_v51 = vadd.f32 %v1953_v9, %v1940_v47 }
 0x240   : > { %v1974_v2 = vmax.f32 %v1964_v49, 0.0 }
 0x241   : > { %v1975_v53 = vmax.f32 %v1965_v51, 0.0 }
 0x242   : > { %v1980_v58 = vpack.c.bf16 %v1974_v2, %v1974_v2 }
 0x243   : > { %v1981_v57 = vpack.c.bf16 %v1975_v53, %v1975_v53 }
 0x245   : > { %2238 = vmatprep.mubr.bf16.mxu0 %v1981_v57 }
 0x246   : > { %2239 = vmatmul.mubr.bf16.gmra.mrb[32].mxu0 %v1980_v58 }
 0x309   : > { %v2220_v62 = vpop.f32.mrb[24].mxu0 }
 0x30a   : > { %v2221_v63 = vadd.f32 %v2220_v62, %v2019_v60  ;;  %v2222_v0 = vpop.f32.mrb[25].mxu0 }
 0x30b   : > { %v2223_v1 = vadd.f32 %v2222_v0, %v2023_v61  ;;  %v2224_v3 = vpop.f32.mrb[26].mxu0 }
 0x30c   : > { %2247 = vst [vmem:[%s3801_s21] sm:$0xff] %v2221_v63  ;;  %v2257_v4 = vsub.f32 %v3673_v56, %v2221_v63  ;;  %v2225_v6 = vadd.f32 %v2224_v3, %v2019_v60  ;;  %v2226_v5 = vpop.f32.mrb[27].mxu0 }
 0x30d   : > { %2248 = vst [vmem:[%s3801_s21 + $0x8] sm:$0xff] %v2223_v1  ;;  %v2258_v7 = vsub.f32 %v3669_v54, %v2223_v1  ;;  %v2227_v8 = vadd.f32 %v2226_v5, %v2023_v61 }
 0x30e   : > { %v2267_v9 = vmax.f32 %v2257_v4, -100.0  ;;  %2249 = vst [vmem:[%s3801_s21 + $0x10] sm:$0xff] %v2225_v6  ;;  %v2259_v56 = vsub.f32 %v3667_v52, %v2225_v6 }
 0x30f   : > { %v2268_v10 = vmax.f32 %v2258_v7, -100.0  ;;  %2250 = vst [vmem:[%s3801_s21 + $0x18] sm:$0xff] %v2227_v8  ;;  %v2260_v11 = vsub.f32 %v3671_v55, %v2227_v8 }
 0x310   : > { %2277 = vst [vmem:[%s3808_s23] sm:$0xff] %v2267_v9  ;;  %v2269_v12 = vmax.f32 %v2259_v56, -100.0 }
 0x311   : > { %2278 = vst [vmem:[%s3808_s23 + $0x8] sm:$0xff] %v2268_v10  ;;  %v2270_v17 = vmax.f32 %v2260_v11, -100.0  ;;  %v2230_v19 = vpop.f32.mrb[28].mxu0 }
 0x312   : > { %2279 = vst [vmem:[%s3808_s23 + $0x10] sm:$0xff] %v2269_v12  ;;  %v2231_v54 = vadd.f32 %v2230_v19, %v2019_v60  ;;  %v2232_v20 = vpop.f32.mrb[29].mxu0 }
 0x313   : > { %2280 = vst [vmem:[%s3808_s23 + $0x18] sm:$0xff] %v2270_v17  ;;  %v2233_v21 = vadd.f32 %v2232_v20, %v2023_v61  ;;  %v2234_v22 = vpop.f32.mrb[30].mxu0 }
 0x314   : > { %2251 = vst [vmem:[%s3801_s21 + $0x20] sm:$0xff] %v2231_v54  ;;  %v2261_v52 = vsub.f32 %v3703_v16, %v2231_v54  ;;  %v2235_v55 = vadd.f32 %v2234_v22, %v2019_v60  ;;  %v2236_v23 = vpop.f32.mrb[31].mxu0 }
 0x315   : > { %2252 = vst [vmem:[%s3801_s21 + $0x28] sm:$0xff] %v2233_v21  ;;  %v2262_v24 = vsub.f32 %v3699_v14, %v2233_v21  ;;  %v2237_v25 = vadd.f32 %v2236_v23, %v2023_v61 }
 0x316   : > { %v2271_v26 = vmax.f32 %v2261_v52, -100.0  ;;  %2253 = vst [vmem:[%s3801_s21 + $0x30] sm:$0xff] %v2235_v55  ;;  %v2263_v27 = vsub.f32 %v3697_v13, %v2235_v55 }
 0x317   : > { %v2272_v28 = vmax.f32 %v2262_v24, -100.0  ;;  %2254 = vst [vmem:[%s3801_s21 + $0x38] sm:$0xff] %v2237_v25  ;;  %v2264_v29 = vsub.f32 %v3701_v15, %v2237_v25 }
 0x318   : > { %2281 = vst [vmem:[%s3808_s23 + $0x20] sm:$0xff] %v2271_v26  ;;  %v2273_v16 = vmax.f32 %v2263_v27, -100.0 }
 0x319   : > { %2282 = vst [vmem:[%s3808_s23 + $0x28] sm:$0xff] %v2272_v28  ;;  %v2274_v30 = vmax.f32 %v2264_v29, -100.0  ;;  %v2240_v31 = vpop.f32.mrb[32].mxu0 }
 0x31a   : > { %2283 = vst [vmem:[%s3808_s23 + $0x30] sm:$0xff] %v2273_v16  ;;  %v2241_v14 = vadd.f32 %v2240_v31, %v2019_v60  ;;  %v2242_v18 = vpop.f32.mrb[33].mxu0 }
 0x31b   : > { %2284 = vst [vmem:[%s3808_s23 + $0x38] sm:$0xff] %v2274_v30  ;;  %v2243_v33 = vadd.f32 %v2242_v18, %v2023_v61  ;;  %v2244_v35 = vpop.f32.mrb[34].mxu0 }
 0x31c   : > { %2255 = vst [vmem:[%s3801_s21 + $0x40] sm:$0xff] %v2241_v14  ;;  %v2265_v13 = vsub.f32 %v3723_v34, %v2241_v14  ;;  %v2245_v36 = vpop.f32.mrb[35].mxu0 }
 0x31d   : > { %2256 = vst [vmem:[%s3801_s21 + $0x48] sm:$0xff] %v2243_v33  ;;  %v2266_v15 = vsub.f32 %v3718_v32, %v2243_v33 }
 0x31e   : > { %v2275_v37 = vmax.f32 %v2265_v13, -100.0 }
 0x31f   : > { %v2276_v38 = vmax.f32 %v2266_v15, -100.0 }
 0x320   : > { %2285 = vst [vmem:[%s3808_s23 + $0x40] sm:$0xff] %v2275_v37 }
 0x321   : > { %2286 = vst [vmem:[%s3808_s23 + $0x48] sm:$0xff] %v2276_v38 }
 0x322 PF: > { %s24_s27 = sadd.s32 1, %s3104_s27   ;;  %s3865_s25 = smov %s3100_s26 }
 0x323   : > { %p21_p5 = scmp.ge.s32.totalorder %s24_s27, 4   ;;  %s3866_s26 = smov %s3868_s28 }
 0x325   :  { %23 = sbr.rel (!%p21_p5) target bundleno = 2 (0x2), region = 132 }

</bundles_post_ra>
